<compile_context>
chip_gen: v7x
topology: tpu7x:2x2x1
jax: 0.10.0
libtpu: 0.0.40
codegen_flags: <defaults>
</compile_context>

<pallas_src>
import numpy as np
import jax
import jax.numpy as jnp
from jax.experimental import pallas as pl
from jax.experimental.pallas import tpu as pltpu

# ---- small synthetic config ------------------------------------------------
B = 2            # batch
S = 16           # seq_len
H = 128          # hidden_size
NUM_HEADS = 4
NUM_KV_HEADS = 2
HEAD_DIM = H // NUM_HEADS          # 32
GROUPS = NUM_HEADS // NUM_KV_HEADS
INTER = 256                        # intermediate_size
EPS = 1e-6                         # rms_norm_eps
ROPE_THETA = 10000.0

QW = NUM_HEADS * HEAD_DIM          # 128
KW = NUM_KV_HEADS * HEAD_DIM       # 64


def _rotate_half(x):
    d = x.shape[-1]
    x1 = x[..., : d // 2]
    x2 = x[..., d // 2:]
    return jnp.concatenate([-x2, x1], axis=-1)


def _make_rot_weight(w, n_heads):
    """Permute+sign columns so that x @ w_rot == rotate_half(x @ w) per head."""
    h_in = w.shape[0]
    w3 = w.reshape(h_in, n_heads, HEAD_DIM)
    w1 = w3[..., : HEAD_DIM // 2]
    w2 = w3[..., HEAD_DIM // 2:]
    return jnp.concatenate([-w2, w1], axis=-1).reshape(h_in, n_heads * HEAD_DIM)


def decoder_layer_kernel(x_ref, wqkvr_ref, wo_ref, wgu_ref, wd_ref,
                         g_in_ref, g_post_ref,
                         cosq_ref, sinq_ref, cosk_ref, sink_ref,
                         o_ref, attn_ref):
    # One grid step = one batch element. All weights fully resident in VMEM.
    x = x_ref[0]                                   # (S, H) f32
    residual = x

    # --- input RMSNorm (f32 on the VPU) ---
    var = jnp.mean(x * x, axis=-1, keepdims=True)
    xn = x * jax.lax.rsqrt(var + EPS) * g_in_ref[...]
    xn_bf = xn.astype(jnp.bfloat16)

    # --- fused QKV (+ pre-rotated q/k columns) projection: bf16 MXU, f32 acc ---
    qkvr = jnp.dot(xn_bf, wqkvr_ref[...], preferred_element_type=jnp.float32)
    q = qkvr[:, 0:QW]
    q_rot = qkvr[:, QW:2 * QW]
    k = qkvr[:, 2 * QW:2 * QW + KW]
    k_rot = qkvr[:, 2 * QW + KW:2 * QW + 2 * KW]
    v = qkvr[:, 2 * QW + 2 * KW:2 * QW + 3 * KW]

    # --- full-width RoPE; rotate_half baked into *_rot weight columns.
    # 1/sqrt(head_dim) softmax scale is folded into cos_q/sin_q on the host.
    q_rope = q * cosq_ref[...] + q_rot * sinq_ref[...]      # (S, QW)
    k_rope = k * cosk_ref[...] + k_rot * sink_ref[...]      # (S, KW)

    q_bf = q_rope.astype(jnp.bfloat16)
    k_bf = k_rope.astype(jnp.bfloat16)
    v_bf = v.astype(jnp.bfloat16)

    # --- per-head SDPA (non-causal, matching the reference forward).
    # Each head's (S, HEAD_DIM) output is written directly into a VMEM scratch
    # at a static lane offset (no concatenate of 32-lane pieces).
    for j in range(NUM_KV_HEADS):
        kh = k_bf[:, j * HEAD_DIM:(j + 1) * HEAD_DIM]
        vh = v_bf[:, j * HEAD_DIM:(j + 1) * HEAD_DIM]
        for gi in range(GROUPS):
            h = j * GROUPS + gi
            qh = q_bf[:, h * HEAD_DIM:(h + 1) * HEAD_DIM]
            s = jax.lax.dot_general(qh, kh, (((1,), (1,)), ((), ())),
                                    preferred_element_type=jnp.float32)
            s = s - jnp.max(s, axis=-1, keepdims=True)
            p = jnp.exp(s)
            p = p * pl.reciprocal(jnp.sum(p, axis=-1, keepdims=True),
                                  approx=True)
            attn_ref[:, h * HEAD_DIM:(h + 1) * HEAD_DIM] = jnp.dot(
                p.astype(jnp.bfloat16), vh,
                preferred_element_type=jnp.float32)

    attn = jnp.dot(attn_ref[...].astype(jnp.bfloat16), wo_ref[...],
                   preferred_element_type=jnp.float32)
    hs = residual + attn

    # --- post-attention RMSNorm + fused gate|up MLP ---
    residual2 = hs
    var2 = jnp.mean(hs * hs, axis=-1, keepdims=True)
    hn = hs * jax.lax.rsqrt(var2 + EPS) * g_post_ref[...]
    gu = jnp.dot(hn.astype(jnp.bfloat16), wgu_ref[...],
                 preferred_element_type=jnp.float32)       # (S, 2*INTER)
    gate = gu[:, :INTER]
    up = gu[:, INTER:]
    act = gate * jax.nn.sigmoid(gate) * up                 # SiLU(gate) * up
    mlp = jnp.dot(act.astype(jnp.bfloat16), wd_ref[...],
                  preferred_element_type=jnp.float32)
    o_ref[0] = residual2 + mlp


@jax.jit
def llama_decoder_layer(hidden_states, wqkvr, wo, wgu, wd,
                        g_in, g_post, cos_q, sin_q, cos_k, sin_k):
    b, s, h = hidden_states.shape

    def full(a):
        return pl.BlockSpec(a.shape, lambda i: (0,) * a.ndim)

    return pl.pallas_call(
        decoder_layer_kernel,
        out_shape=jax.ShapeDtypeStruct((b, s, h), hidden_states.dtype),
        grid_spec=pltpu.PrefetchScalarGridSpec(
            num_scalar_prefetch=0,
            grid=(b,),
            in_specs=[
                pl.BlockSpec((1, s, h), lambda i: (i, 0, 0)),   # hidden_states
                full(wqkvr), full(wo), full(wgu), full(wd),
                full(g_in), full(g_post),
                full(cos_q), full(sin_q), full(cos_k), full(sin_k),
            ],
            out_specs=pl.BlockSpec((1, s, h), lambda i: (i, 0, 0)),
            scratch_shapes=[pltpu.VMEM((s, h), jnp.float32)],   # attn heads
        ),
        compiler_params=pltpu.CompilerParams(
            dimension_semantics=("parallel",)),
    )(hidden_states, wqkvr, wo, wgu, wd, g_in, g_post,
      cos_q, sin_q, cos_k, sin_k)


# ---------------- pure-JAX fp32 reference (module semantics) ----------------
def reference(x, wq, wk, wv, wo, wg, wu, wd, g_in, g_post, cos, sin):
    def rms(hh, g):
        v = jnp.mean(hh * hh, axis=-1, keepdims=True)
        return hh * jax.lax.rsqrt(v + EPS) * g[0]
    res = x
    xn = rms(x, g_in)
    q = xn @ wq; k = xn @ wk; v = xn @ wv
    q = q.reshape(B, S, NUM_HEADS, HEAD_DIM).transpose(0, 2, 1, 3)
    k = k.reshape(B, S, NUM_KV_HEADS, HEAD_DIM).transpose(0, 2, 1, 3)
    v = v.reshape(B, S, NUM_KV_HEADS, HEAD_DIM).transpose(0, 2, 1, 3)
    c = cos[None, None]; s_ = sin[None, None]
    q = q * c + _rotate_half(q) * s_
    k = k * c + _rotate_half(k) * s_
    k = jnp.repeat(k, GROUPS, axis=1)
    v = jnp.repeat(v, GROUPS, axis=1)
    scores = jnp.einsum('bhqd,bhkd->bhqk', q, k) / (HEAD_DIM ** 0.5)
    p = jax.nn.softmax(scores, axis=-1)
    attn = jnp.einsum('bhqk,bhkd->bhqd', p, v)
    attn = attn.transpose(0, 2, 1, 3).reshape(B, S, H) @ wo
    h1 = res + attn
    hn = rms(h1, g_post)
    gate = hn @ wg; up = hn @ wu
    mlp = (jax.nn.silu(gate) * up) @ wd
    return h1 + mlp


if __name__ == "__main__":
    key = jax.random.PRNGKey(0)
    ks = jax.random.split(key, 10)
    f32 = jnp.float32
    x = jax.random.normal(ks[0], (B, S, H), f32)
    # Linear weights, stored pre-transposed to (in_features, out_features).
    wq = 0.05 * jax.random.normal(ks[1], (H, NUM_HEADS * HEAD_DIM), f32)
    wk = 0.05 * jax.random.normal(ks[2], (H, NUM_KV_HEADS * HEAD_DIM), f32)
    wv = 0.05 * jax.random.normal(ks[3], (H, NUM_KV_HEADS * HEAD_DIM), f32)
    wo = 0.05 * jax.random.normal(ks[4], (H, H), f32)
    wg = 0.05 * jax.random.normal(ks[5], (H, INTER), f32)
    wu = 0.05 * jax.random.normal(ks[6], (H, INTER), f32)
    wd = 0.05 * jax.random.normal(ks[7], (INTER, H), f32)
    g_in = jnp.ones((1, H), f32)       # LlamaRMSNorm init
    g_post = jnp.ones((1, H), f32)

    # RoPE tables (position_ids = arange(S)) — parameter-setup glue.
    inv_freq = 1.0 / (ROPE_THETA ** (jnp.arange(0, HEAD_DIM, 2, dtype=f32) / HEAD_DIM))
    pos = jnp.arange(S, dtype=f32)
    freqs = pos[:, None] * inv_freq[None, :]
    emb = jnp.concatenate([freqs, freqs], axis=-1)
    cos = jnp.cos(emb)                 # (S, HEAD_DIM)
    sin = jnp.sin(emb)

    # ---- host-side weight/table packing (parameter-setup glue) ----
    bf16 = jnp.bfloat16
    wq_rot = _make_rot_weight(wq, NUM_HEADS)
    wk_rot = _make_rot_weight(wk, NUM_KV_HEADS)
    # fused [q | q_rot | k | k_rot | v] : (H, 448) bf16
    wqkvr = jnp.concatenate([wq, wq_rot, wk, wk_rot, wv], axis=1).astype(bf16)
    # fused [gate | up] : (H, 2*INTER) bf16
    wgu = jnp.concatenate([wg, wu], axis=1).astype(bf16)
    wo_bf = wo.astype(bf16)
    wd_bf = wd.astype(bf16)

    scale = 1.0 / (HEAD_DIM ** 0.5)
    cos_q = jnp.tile(cos, (1, NUM_HEADS)) * scale      # (S, 128), scale folded
    sin_q = jnp.tile(sin, (1, NUM_HEADS)) * scale
    cos_k = jnp.tile(cos, (1, NUM_KV_HEADS))           # (S, 64)
    sin_k = jnp.tile(sin, (1, NUM_KV_HEADS))

    out = llama_decoder_layer(x, wqkvr, wo_bf, wgu, wd_bf,
                              g_in, g_post, cos_q, sin_q, cos_k, sin_k)
    out = jax.block_until_ready(out)

    ref = reference(x, wq, wk, wv, wo, wg, wu, wd, g_in, g_post, cos, sin)
    # Tolerance loosened vs. the fp32 reference because MXU operands are bf16
    # and the softmax uses the approx EUP reciprocal.
    np.testing.assert_allclose(np.asarray(out), np.asarray(ref),
                               rtol=3e-2, atol=3e-2)
    print("KERNEL_OK")
</pallas_src>

<mosaic_0001>
module attributes {stable_mosaic.version = 11 : i64} {
  func.func @decoder_layer_kernel(%arg0: i32, %arg1: memref<1x16x128xf32, #tpu.memory_space<vmem>>, %arg2: memref<128x448xbf16, #tpu.memory_space<vmem>>, %arg3: memref<128x128xbf16, #tpu.memory_space<vmem>>, %arg4: memref<128x512xbf16, #tpu.memory_space<vmem>>, %arg5: memref<256x128xbf16, #tpu.memory_space<vmem>>, %arg6: memref<1x128xf32, #tpu.memory_space<vmem>>, %arg7: memref<1x128xf32, #tpu.memory_space<vmem>>, %arg8: memref<16x128xf32, #tpu.memory_space<vmem>>, %arg9: memref<16x128xf32, #tpu.memory_space<vmem>>, %arg10: memref<16x64xf32, #tpu.memory_space<vmem>>, %arg11: memref<16x64xf32, #tpu.memory_space<vmem>>, %arg12: memref<1x16x128xf32, #tpu.memory_space<vmem>>, %arg13: memref<16x128xf32, #tpu.memory_space<vmem>>) attributes {dimension_semantics = [#tpu.dimension_semantics<parallel>], iteration_bounds = array<i64: 2>, scalar_prefetch = 0 : i64, scratch_operands = 1 : i64, tpu.core_type = #tpu.core_type<tc>, window_params = [{transform_indices = @transform_0, window_bounds = array<i64: 1, 16, 128>}, {pipeline_mode = #tpu.pipeline_mode<synchronous>, transform_indices = @transform_1, window_bounds = array<i64: 128, 448>}, {pipeline_mode = #tpu.pipeline_mode<synchronous>, transform_indices = @transform_2, window_bounds = array<i64: 128, 128>}, {pipeline_mode = #tpu.pipeline_mode<synchronous>, transform_indices = @transform_3, window_bounds = array<i64: 128, 512>}, {pipeline_mode = #tpu.pipeline_mode<synchronous>, transform_indices = @transform_4, window_bounds = array<i64: 256, 128>}, {pipeline_mode = #tpu.pipeline_mode<synchronous>, transform_indices = @transform_5, window_bounds = array<i64: 1, 128>}, {pipeline_mode = #tpu.pipeline_mode<synchronous>, transform_indices = @transform_6, window_bounds = array<i64: 1, 128>}, {pipeline_mode = #tpu.pipeline_mode<synchronous>, transform_indices = @transform_7, window_bounds = array<i64: 16, 128>}, {pipeline_mode = #tpu.pipeline_mode<synchronous>, transform_indices = @transform_8, window_bounds = array<i64: 16, 128>}, {pipeline_mode = #tpu.pipeline_mode<synchronous>, transform_indices = @transform_9, window_bounds = array<i64: 16, 64>}, {pipeline_mode = #tpu.pipeline_mode<synchronous>, transform_indices = @transform_10, window_bounds = array<i64: 16, 64>}, {transform_indices = @transform_11, window_bounds = array<i64: 1, 16, 128>}]} {
    %c0 = arith.constant 0 : index
    %c0_0 = arith.constant 0 : index
    %c0_1 = arith.constant 0 : index
    %0 = vector.load %arg1[%c0, %c0_0, %c0_1] : memref<1x16x128xf32, #tpu.memory_space<vmem>>, vector<1x16x128xf32>
    %1 = vector.shape_cast %0 : vector<1x16x128xf32> to vector<16x128xf32>
    %2 = arith.mulf %1, %1 : vector<16x128xf32>
    %cst = arith.constant dense<0.000000e+00> : vector<16xf32>
    %3 = vector.multi_reduction <add>, %2, %cst [1] : vector<16x128xf32> to vector<16xf32>
    %4 = vector.shape_cast %3 : vector<16xf32> to vector<16x1xf32>
    %cst_2 = arith.constant 1.280000e+02 : f32
    %5 = vector.broadcast %cst_2 : f32 to vector<16x1xf32>
    %6 = arith.divf %4, %5 : vector<16x1xf32>
    %cst_3 = arith.constant 9.99999997E-7 : f32
    %7 = vector.broadcast %cst_3 : f32 to vector<16x1xf32>
    %8 = arith.addf %6, %7 : vector<16x1xf32>
    %9 = math.rsqrt %8 : vector<16x1xf32>
    %10 = vector.broadcast %9 : vector<16x1xf32> to vector<16x128xf32>
    %11 = arith.mulf %1, %10 : vector<16x128xf32>
    %c0_4 = arith.constant 0 : index
    %c0_5 = arith.constant 0 : index
    %12 = vector.load %arg6[%c0_4, %c0_5] : memref<1x128xf32, #tpu.memory_space<vmem>>, vector<1x128xf32>
    %13 = vector.broadcast %12 : vector<1x128xf32> to vector<16x128xf32>
    %14 = arith.mulf %11, %13 : vector<16x128xf32>
    %15 = arith.truncf %14 : vector<16x128xf32> to vector<16x128xbf16>
    %c0_6 = arith.constant 0 : index
    %c0_7 = arith.constant 0 : index
    %16 = vector.load %arg2[%c0_6, %c0_7] : memref<128x448xbf16, #tpu.memory_space<vmem>>, vector<128x448xbf16>
    %cst_8 = arith.constant dense<0.000000e+00> : vector<16x448xf32>
    %17 = tpu.matmul %15, %16, %cst_8 {dimension_numbers = #tpu.dot_dimension_numbers<[1], [0], [0], [1], [0, 0, 1, 1], [], []>} : vector<16x128xbf16>, vector<128x448xbf16>, vector<16x448xf32> -> vector<16x448xf32>
    %18 = vector.extract_strided_slice %17 {offsets = [0, 0], sizes = [16, 128], strides = [1, 1]} : vector<16x448xf32> to vector<16x128xf32>
    %19 = vector.extract_strided_slice %17 {offsets = [0, 128], sizes = [16, 128], strides = [1, 1]} : vector<16x448xf32> to vector<16x128xf32>
    %20 = vector.extract_strided_slice %17 {offsets = [0, 256], sizes = [16, 64], strides = [1, 1]} : vector<16x448xf32> to vector<16x64xf32>
    %21 = vector.extract_strided_slice %17 {offsets = [0, 320], sizes = [16, 64], strides = [1, 1]} : vector<16x448xf32> to vector<16x64xf32>
    %22 = vector.extract_strided_slice %17 {offsets = [0, 384], sizes = [16, 64], strides = [1, 1]} : vector<16x448xf32> to vector<16x64xf32>
    %c0_9 = arith.constant 0 : index
    %c0_10 = arith.constant 0 : index
    %23 = vector.load %arg8[%c0_9, %c0_10] : memref<16x128xf32, #tpu.memory_space<vmem>>, vector<16x128xf32>
    %24 = arith.mulf %18, %23 : vector<16x128xf32>
    %c0_11 = arith.constant 0 : index
    %c0_12 = arith.constant 0 : index
    %25 = vector.load %arg9[%c0_11, %c0_12] : memref<16x128xf32, #tpu.memory_space<vmem>>, vector<16x128xf32>
    %26 = arith.mulf %19, %25 : vector<16x128xf32>
    %27 = arith.addf %24, %26 : vector<16x128xf32>
    %c0_13 = arith.constant 0 : index
    %c0_14 = arith.constant 0 : index
    %28 = vector.load %arg10[%c0_13, %c0_14] : memref<16x64xf32, #tpu.memory_space<vmem>>, vector<16x64xf32>
    %29 = arith.mulf %20, %28 : vector<16x64xf32>
    %c0_15 = arith.constant 0 : index
    %c0_16 = arith.constant 0 : index
    %30 = vector.load %arg11[%c0_15, %c0_16] : memref<16x64xf32, #tpu.memory_space<vmem>>, vector<16x64xf32>
    %31 = arith.mulf %21, %30 : vector<16x64xf32>
    %32 = arith.addf %29, %31 : vector<16x64xf32>
    %33 = arith.truncf %27 : vector<16x128xf32> to vector<16x128xbf16>
    %34 = arith.truncf %32 : vector<16x64xf32> to vector<16x64xbf16>
    %35 = arith.truncf %22 : vector<16x64xf32> to vector<16x64xbf16>
    %36 = vector.extract_strided_slice %34 {offsets = [0, 0], sizes = [16, 32], strides = [1, 1]} : vector<16x64xbf16> to vector<16x32xbf16>
    %37 = vector.extract_strided_slice %35 {offsets = [0, 0], sizes = [16, 32], strides = [1, 1]} : vector<16x64xbf16> to vector<16x32xbf16>
    %38 = vector.extract_strided_slice %33 {offsets = [0, 0], sizes = [16, 32], strides = [1, 1]} : vector<16x128xbf16> to vector<16x32xbf16>
    %cst_17 = arith.constant dense<0.000000e+00> : vector<16x16xf32>
    %39 = tpu.matmul %38, %36, %cst_17 {dimension_numbers = #tpu.dot_dimension_numbers<[1], [1], [0], [0], [0, 0, 1, 0], [], []>} : vector<16x32xbf16>, vector<16x32xbf16>, vector<16x16xf32> -> vector<16x16xf32>
    %cst_18 = arith.constant dense<0xFF800000> : vector<16xf32>
    %40 = vector.multi_reduction <maximumf>, %39, %cst_18 [1] : vector<16x16xf32> to vector<16xf32>
    %41 = vector.shape_cast %40 : vector<16xf32> to vector<16x1xf32>
    %42 = vector.broadcast %41 : vector<16x1xf32> to vector<16x16xf32>
    %43 = arith.subf %39, %42 : vector<16x16xf32>
    %44 = math.exp %43 : vector<16x16xf32>
    %cst_19 = arith.constant dense<0.000000e+00> : vector<16xf32>
    %45 = vector.multi_reduction <add>, %44, %cst_19 [1] : vector<16x16xf32> to vector<16xf32>
    %46 = vector.shape_cast %45 : vector<16xf32> to vector<16x1xf32>
    %47 = tpu.reciprocal %46 {approx = true} : vector<16x1xf32> -> vector<16x1xf32>
    %48 = vector.broadcast %47 : vector<16x1xf32> to vector<16x16xf32>
    %49 = arith.mulf %44, %48 : vector<16x16xf32>
    %50 = arith.truncf %49 : vector<16x16xf32> to vector<16x16xbf16>
    %cst_20 = arith.constant dense<0.000000e+00> : vector<16x32xf32>
    %51 = tpu.matmul %50, %37, %cst_20 {dimension_numbers = #tpu.dot_dimension_numbers<[1], [0], [0], [1], [0, 0, 1, 1], [], []>} : vector<16x16xbf16>, vector<16x32xbf16>, vector<16x32xf32> -> vector<16x32xf32>
    %c0_21 = arith.constant 0 : index
    %c0_22 = arith.constant 0 : index
    %52 = vector.load %arg13[%c0_21, %c0_22] : memref<16x128xf32, #tpu.memory_space<vmem>>, vector<16x32xf32>
    tpu.vector_store %arg13[%c0_21, %c0_22], %51 {strides = array<i32>} : memref<16x128xf32, #tpu.memory_space<vmem>>, vector<16x32xf32>,
    %53 = vector.extract_strided_slice %33 {offsets = [0, 32], sizes = [16, 32], strides = [1, 1]} : vector<16x128xbf16> to vector<16x32xbf16>
    %cst_23 = arith.constant dense<0.000000e+00> : vector<16x16xf32>
    %54 = tpu.matmul %53, %36, %cst_23 {dimension_numbers = #tpu.dot_dimension_numbers<[1], [1], [0], [0], [0, 0, 1, 0], [], []>} : vector<16x32xbf16>, vector<16x32xbf16>, vector<16x16xf32> -> vector<16x16xf32>
    %cst_24 = arith.constant dense<0xFF800000> : vector<16xf32>
    %55 = vector.multi_reduction <maximumf>, %54, %cst_24 [1] : vector<16x16xf32> to vector<16xf32>
    %56 = vector.shape_cast %55 : vector<16xf32> to vector<16x1xf32>
    %57 = vector.broadcast %56 : vector<16x1xf32> to vector<16x16xf32>
    %58 = arith.subf %54, %57 : vector<16x16xf32>
    %59 = math.exp %58 : vector<16x16xf32>
    %cst_25 = arith.constant dense<0.000000e+00> : vector<16xf32>
    %60 = vector.multi_reduction <add>, %59, %cst_25 [1] : vector<16x16xf32> to vector<16xf32>
    %61 = vector.shape_cast %60 : vector<16xf32> to vector<16x1xf32>
    %62 = tpu.reciprocal %61 {approx = true} : vector<16x1xf32> -> vector<16x1xf32>
    %63 = vector.broadcast %62 : vector<16x1xf32> to vector<16x16xf32>
    %64 = arith.mulf %59, %63 : vector<16x16xf32>
    %65 = arith.truncf %64 : vector<16x16xf32> to vector<16x16xbf16>
    %cst_26 = arith.constant dense<0.000000e+00> : vector<16x32xf32>
    %66 = tpu.matmul %65, %37, %cst_26 {dimension_numbers = #tpu.dot_dimension_numbers<[1], [0], [0], [1], [0, 0, 1, 1], [], []>} : vector<16x16xbf16>, vector<16x32xbf16>, vector<16x32xf32> -> vector<16x32xf32>
    %c0_27 = arith.constant 0 : index
    %c32 = arith.constant 32 : index
    %67 = vector.load %arg13[%c0_27, %c32] : memref<16x128xf32, #tpu.memory_space<vmem>>, vector<16x32xf32>
    tpu.vector_store %arg13[%c0_27, %c32], %66 {strides = array<i32>} : memref<16x128xf32, #tpu.memory_space<vmem>>, vector<16x32xf32>,
    %68 = vector.extract_strided_slice %34 {offsets = [0, 32], sizes = [16, 32], strides = [1, 1]} : vector<16x64xbf16> to vector<16x32xbf16>
    %69 = vector.extract_strided_slice %35 {offsets = [0, 32], sizes = [16, 32], strides = [1, 1]} : vector<16x64xbf16> to vector<16x32xbf16>
    %70 = vector.extract_strided_slice %33 {offsets = [0, 64], sizes = [16, 32], strides = [1, 1]} : vector<16x128xbf16> to vector<16x32xbf16>
    %cst_28 = arith.constant dense<0.000000e+00> : vector<16x16xf32>
    %71 = tpu.matmul %70, %68, %cst_28 {dimension_numbers = #tpu.dot_dimension_numbers<[1], [1], [0], [0], [0, 0, 1, 0], [], []>} : vector<16x32xbf16>, vector<16x32xbf16>, vector<16x16xf32> -> vector<16x16xf32>
    %cst_29 = arith.constant dense<0xFF800000> : vector<16xf32>
    %72 = vector.multi_reduction <maximumf>, %71, %cst_29 [1] : vector<16x16xf32> to vector<16xf32>
    %73 = vector.shape_cast %72 : vector<16xf32> to vector<16x1xf32>
    %74 = vector.broadcast %73 : vector<16x1xf32> to vector<16x16xf32>
    %75 = arith.subf %71, %74 : vector<16x16xf32>
    %76 = math.exp %75 : vector<16x16xf32>
    %cst_30 = arith.constant dense<0.000000e+00> : vector<16xf32>
    %77 = vector.multi_reduction <add>, %76, %cst_30 [1] : vector<16x16xf32> to vector<16xf32>
    %78 = vector.shape_cast %77 : vector<16xf32> to vector<16x1xf32>
    %79 = tpu.reciprocal %78 {approx = true} : vector<16x1xf32> -> vector<16x1xf32>
    %80 = vector.broadcast %79 : vector<16x1xf32> to vector<16x16xf32>
    %81 = arith.mulf %76, %80 : vector<16x16xf32>
    %82 = arith.truncf %81 : vector<16x16xf32> to vector<16x16xbf16>
    %cst_31 = arith.constant dense<0.000000e+00> : vector<16x32xf32>
    %83 = tpu.matmul %82, %69, %cst_31 {dimension_numbers = #tpu.dot_dimension_numbers<[1], [0], [0], [1], [0, 0, 1, 1], [], []>} : vector<16x16xbf16>, vector<16x32xbf16>, vector<16x32xf32> -> vector<16x32xf32>
    %c0_32 = arith.constant 0 : index
    %c64 = arith.constant 64 : index
    %84 = vector.load %arg13[%c0_32, %c64] : memref<16x128xf32, #tpu.memory_space<vmem>>, vector<16x32xf32>
    tpu.vector_store %arg13[%c0_32, %c64], %83 {strides = array<i32>} : memref<16x128xf32, #tpu.memory_space<vmem>>, vector<16x32xf32>,
    %85 = vector.extract_strided_slice %33 {offsets = [0, 96], sizes = [16, 32], strides = [1, 1]} : vector<16x128xbf16> to vector<16x32xbf16>
    %cst_33 = arith.constant dense<0.000000e+00> : vector<16x16xf32>
    %86 = tpu.matmul %85, %68, %cst_33 {dimension_numbers = #tpu.dot_dimension_numbers<[1], [1], [0], [0], [0, 0, 1, 0], [], []>} : vector<16x32xbf16>, vector<16x32xbf16>, vector<16x16xf32> -> vector<16x16xf32>
    %cst_34 = arith.constant dense<0xFF800000> : vector<16xf32>
    %87 = vector.multi_reduction <maximumf>, %86, %cst_34 [1] : vector<16x16xf32> to vector<16xf32>
    %88 = vector.shape_cast %87 : vector<16xf32> to vector<16x1xf32>
    %89 = vector.broadcast %88 : vector<16x1xf32> to vector<16x16xf32>
    %90 = arith.subf %86, %89 : vector<16x16xf32>
    %91 = math.exp %90 : vector<16x16xf32>
    %cst_35 = arith.constant dense<0.000000e+00> : vector<16xf32>
    %92 = vector.multi_reduction <add>, %91, %cst_35 [1] : vector<16x16xf32> to vector<16xf32>
    %93 = vector.shape_cast %92 : vector<16xf32> to vector<16x1xf32>
    %94 = tpu.reciprocal %93 {approx = true} : vector<16x1xf32> -> vector<16x1xf32>
    %95 = vector.broadcast %94 : vector<16x1xf32> to vector<16x16xf32>
    %96 = arith.mulf %91, %95 : vector<16x16xf32>
    %97 = arith.truncf %96 : vector<16x16xf32> to vector<16x16xbf16>
    %cst_36 = arith.constant dense<0.000000e+00> : vector<16x32xf32>
    %98 = tpu.matmul %97, %69, %cst_36 {dimension_numbers = #tpu.dot_dimension_numbers<[1], [0], [0], [1], [0, 0, 1, 1], [], []>} : vector<16x16xbf16>, vector<16x32xbf16>, vector<16x32xf32> -> vector<16x32xf32>
    %c0_37 = arith.constant 0 : index
    %c96 = arith.constant 96 : index
    %99 = vector.load %arg13[%c0_37, %c96] : memref<16x128xf32, #tpu.memory_space<vmem>>, vector<16x32xf32>
    tpu.vector_store %arg13[%c0_37, %c96], %98 {strides = array<i32>} : memref<16x128xf32, #tpu.memory_space<vmem>>, vector<16x32xf32>,
    %c0_38 = arith.constant 0 : index
    %c0_39 = arith.constant 0 : index
    %100 = vector.load %arg13[%c0_38, %c0_39] : memref<16x128xf32, #tpu.memory_space<vmem>>, vector<16x128xf32>
    %101 = arith.truncf %100 : vector<16x128xf32> to vector<16x128xbf16>
    %c0_40 = arith.constant 0 : index
    %c0_41 = arith.constant 0 : index
    %102 = vector.load %arg3[%c0_40, %c0_41] : memref<128x128xbf16, #tpu.memory_space<vmem>>, vector<128x128xbf16>
    %cst_42 = arith.constant dense<0.000000e+00> : vector<16x128xf32>
    %103 = tpu.matmul %101, %102, %cst_42 {dimension_numbers = #tpu.dot_dimension_numbers<[1], [0], [0], [1], [0, 0, 1, 1], [], []>} : vector<16x128xbf16>, vector<128x128xbf16>, vector<16x128xf32> -> vector<16x128xf32>
    %104 = arith.addf %1, %103 : vector<16x128xf32>
    %105 = arith.mulf %104, %104 : vector<16x128xf32>
    %cst_43 = arith.constant dense<0.000000e+00> : vector<16xf32>
    %106 = vector.multi_reduction <add>, %105, %cst_43 [1] : vector<16x128xf32> to vector<16xf32>
    %107 = vector.shape_cast %106 : vector<16xf32> to vector<16x1xf32>
    %cst_44 = arith.constant 1.280000e+02 : f32
    %108 = vector.broadcast %cst_44 : f32 to vector<16x1xf32>
    %109 = arith.divf %107, %108 : vector<16x1xf32>
    %cst_45 = arith.constant 9.99999997E-7 : f32
    %110 = vector.broadcast %cst_45 : f32 to vector<16x1xf32>
    %111 = arith.addf %109, %110 : vector<16x1xf32>
    %112 = math.rsqrt %111 : vector<16x1xf32>
    %113 = vector.broadcast %112 : vector<16x1xf32> to vector<16x128xf32>
    %114 = arith.mulf %104, %113 : vector<16x128xf32>
    %c0_46 = arith.constant 0 : index
    %c0_47 = arith.constant 0 : index
    %115 = vector.load %arg7[%c0_46, %c0_47] : memref<1x128xf32, #tpu.memory_space<vmem>>, vector<1x128xf32>
    %116 = vector.broadcast %115 : vector<1x128xf32> to vector<16x128xf32>
    %117 = arith.mulf %114, %116 : vector<16x128xf32>
    %118 = arith.truncf %117 : vector<16x128xf32> to vector<16x128xbf16>
    %c0_48 = arith.constant 0 : index
    %c0_49 = arith.constant 0 : index
    %119 = vector.load %arg4[%c0_48, %c0_49] : memref<128x512xbf16, #tpu.memory_space<vmem>>, vector<128x512xbf16>
    %cst_50 = arith.constant dense<0.000000e+00> : vector<16x512xf32>
    %120 = tpu.matmul %118, %119, %cst_50 {dimension_numbers = #tpu.dot_dimension_numbers<[1], [0], [0], [1], [0, 0, 1, 1], [], []>} : vector<16x128xbf16>, vector<128x512xbf16>, vector<16x512xf32> -> vector<16x512xf32>
    %121 = vector.extract_strided_slice %120 {offsets = [0, 0], sizes = [16, 256], strides = [1, 1]} : vector<16x512xf32> to vector<16x256xf32>
    %122 = vector.extract_strided_slice %120 {offsets = [0, 256], sizes = [16, 256], strides = [1, 1]} : vector<16x512xf32> to vector<16x256xf32>
    %123 = arith.negf %121 : vector<16x256xf32>
    %124 = math.exp %123 : vector<16x256xf32>
    %cst_51 = arith.constant 1.000000e+00 : f32
    %125 = vector.broadcast %cst_51 : f32 to vector<16x256xf32>
    %126 = arith.addf %125, %124 : vector<16x256xf32>
    %127 = arith.divf %125, %126 : vector<16x256xf32>
    %128 = arith.mulf %121, %127 : vector<16x256xf32>
    %129 = arith.mulf %128, %122 : vector<16x256xf32>
    %130 = arith.truncf %129 : vector<16x256xf32> to vector<16x256xbf16>
    %c0_52 = arith.constant 0 : index
    %c0_53 = arith.constant 0 : index
    %131 = vector.load %arg5[%c0_52, %c0_53] : memref<256x128xbf16, #tpu.memory_space<vmem>>, vector<256x128xbf16>
    %cst_54 = arith.constant dense<0.000000e+00> : vector<16x128xf32>
    %132 = tpu.matmul %130, %131, %cst_54 {dimension_numbers = #tpu.dot_dimension_numbers<[1], [0], [0], [1], [0, 0, 1, 1], [], []>} : vector<16x256xbf16>, vector<256x128xbf16>, vector<16x128xf32> -> vector<16x128xf32>
    %133 = arith.addf %104, %132 : vector<16x128xf32>
    %c0_55 = arith.constant 0 : index
    %c0_56 = arith.constant 0 : index
    %c0_57 = arith.constant 0 : index
    %134 = vector.load %arg12[%c0_55, %c0_56, %c0_57] : memref<1x16x128xf32, #tpu.memory_space<vmem>>, vector<1x16x128xf32>
    %135 = vector.shape_cast %134 : vector<1x16x128xf32> to vector<16x128xf32>
    %136 = vector.shape_cast %133 : vector<16x128xf32> to vector<1x16x128xf32>
    tpu.vector_store %arg12[%c0_55, %c0_56, %c0_57], %136 {strides = array<i32>} : memref<1x16x128xf32, #tpu.memory_space<vmem>>, vector<1x16x128xf32>,
    return
  }
  func.func @transform_0(%arg0: i32) -> (i32, i32, i32) {
    %c0_i32 = arith.constant 0 : i32
    %c0_i32_0 = arith.constant 0 : i32
    %c0_i32_1 = arith.constant 0 : i32
    return %arg0, %c0_i32, %c0_i32_0 : i32, i32, i32
  }
  func.func @transform_1(%arg0: i32) -> (i32, i32) {
    %c0_i32 = arith.constant 0 : i32
    %c0_i32_0 = arith.constant 0 : i32
    %c0_i32_1 = arith.constant 0 : i32
    return %c0_i32, %c0_i32_0 : i32, i32
  }
  func.func @transform_2(%arg0: i32) -> (i32, i32) {
    %c0_i32 = arith.constant 0 : i32
    %c0_i32_0 = arith.constant 0 : i32
    %c0_i32_1 = arith.constant 0 : i32
    return %c0_i32, %c0_i32_0 : i32, i32
  }
  func.func @transform_3(%arg0: i32) -> (i32, i32) {
    %c0_i32 = arith.constant 0 : i32
    %c0_i32_0 = arith.constant 0 : i32
    %c0_i32_1 = arith.constant 0 : i32
    return %c0_i32, %c0_i32_0 : i32, i32
  }
  func.func @transform_4(%arg0: i32) -> (i32, i32) {
    %c0_i32 = arith.constant 0 : i32
    %c0_i32_0 = arith.constant 0 : i32
    %c0_i32_1 = arith.constant 0 : i32
    return %c0_i32, %c0_i32_0 : i32, i32
  }
  func.func @transform_5(%arg0: i32) -> (i32, i32) {
    %c0_i32 = arith.constant 0 : i32
    %c0_i32_0 = arith.constant 0 : i32
    %c0_i32_1 = arith.constant 0 : i32
    return %c0_i32, %c0_i32_0 : i32, i32
  }
  func.func @transform_6(%arg0: i32) -> (i32, i32) {
    %c0_i32 = arith.constant 0 : i32
    %c0_i32_0 = arith.constant 0 : i32
    %c0_i32_1 = arith.constant 0 : i32
    return %c0_i32, %c0_i32_0 : i32, i32
  }
  func.func @transform_7(%arg0: i32) -> (i32, i32) {
    %c0_i32 = arith.constant 0 : i32
    %c0_i32_0 = arith.constant 0 : i32
    %c0_i32_1 = arith.constant 0 : i32
    return %c0_i32, %c0_i32_0 : i32, i32
  }
  func.func @transform_8(%arg0: i32) -> (i32, i32) {
    %c0_i32 = arith.constant 0 : i32
    %c0_i32_0 = arith.constant 0 : i32
    %c0_i32_1 = arith.constant 0 : i32
    return %c0_i32, %c0_i32_0 : i32, i32
  }
  func.func @transform_9(%arg0: i32) -> (i32, i32) {
    %c0_i32 = arith.constant 0 : i32
    %c0_i32_0 = arith.constant 0 : i32
    %c0_i32_1 = arith.constant 0 : i32
    return %c0_i32, %c0_i32_0 : i32, i32
  }
  func.func @transform_10(%arg0: i32) -> (i32, i32) {
    %c0_i32 = arith.constant 0 : i32
    %c0_i32_0 = arith.constant 0 : i32
    %c0_i32_1 = arith.constant 0 : i32
    return %c0_i32, %c0_i32_0 : i32, i32
  }
  func.func @transform_11(%arg0: i32) -> (i32, i32, i32) {
    %c0_i32 = arith.constant 0 : i32
    %c0_i32_0 = arith.constant 0 : i32
    %c0_i32_1 = arith.constant 0 : i32
    return %arg0, %c0_i32, %c0_i32_0 : i32, i32, i32
  }
}

</mosaic_0001>

<bundles_post_ra>
// kernel: llama_decoder_layer.1
= control target key start
LH: loop header
LB: loop body
LE: loop exit
PB: predicated region body
PF: predicated region fallthrough
CT: control target
= control target key end

     0   :  { %16 = vsyncpa [#allocation4], 0  ;;  %s3233_s0 = inlined_call_operand.vmem [shape: f32[2,16,128], index: 0, kind: input, shape index: {}]   ;;  %s3234_s1 = inlined_call_operand.vmem [shape: bf16[128,448], index: 1, kind: input, shape index: {}]   ;;  %s3235_s2 = inlined_call_operand.vmem [shape: bf16[128,128], index: 2, kind: input, shape index: {}]   ;;  %s3236_s3 = inlined_call_operand.vmem [shape: bf16[128,512], index: 3, kind: input, shape index: {}]   ;;  %s3237_s4 = inlined_call_operand.vmem [shape: bf16[256,128], index: 4, kind: input, shape index: {}]   ;;  %s3238_s5 = inlined_call_operand.vmem [shape: f32[1,128], index: 5, kind: input, shape index: {}]   ;;  %s3239_s6 = inlined_call_operand.vmem [shape: f32[1,128], index: 6, kind: input, shape index: {}]   ;;  %s3240_s7 = inlined_call_operand.vmem [shape: f32[16,128], index: 7, kind: input, shape index: {}]   ;;  %s3241_s8 = inlined_call_operand.hbm [shape: f32[16,128], index: 8, kind: input, shape index: {}]   ;;  %s3242_s9 = inlined_call_operand.hbm [shape: f32[16,64], index: 9, kind: input, shape index: {}]   ;;  %s3243_s10 = inlined_call_operand.vmem [shape: f32[16,64], index: 10, kind: input, shape index: {}]   ;;  %s3244_s11 = inlined_call_operand.hbm [shape: f32[2,16,128], index: 11, kind: output, shape index: {}]  }
   0x1   :  { %17 = vsyncpa [#allocation7], 0 }
   0x2   :  { %18 = vsyncpa [#allocation5], 0 }
   0x3   :  { %20 = vsyncpa [#allocation5 + $0x1], 0  ;;  %s2662_s17 = smov 0   ;;  %s2664_s18 = smov 0  }
   0x4   :  { %s2666_s19 = smov 0   ;;  %s2668_s20 = smov 0  }
   0x5 LB: > { %3253 = sst [smem:[#allocation12_spill]] %s2575_s17  ;;  %s2683_s21 = sadd.s32 4294967295, %s2587_s20   ;;  %s2587_s20 = sphi %s2668_s20, %s3271_s20   ;;  %s2583_s19 = sphi %s2666_s19, %s3276_s19   ;;  %s2579_s18 = sphi %s2664_s18, %s3275_s18   ;;  %s2575_s17 = sphi %s2662_s17, %s3274_s17  }
   0x6   : > { %3254 = sst [smem:[#allocation13_spill]] %s2583_s19  ;;  %s1978_s22 = sadd.s32 4294967294, %s2587_s20  }
   0x7   : > { %s2687_s23 = sadd.s32 1, %s2587_s20   ;;  %s269_s24 = sadd.s32 1, %s2583_s19 }
   0x8   : > { %3255 = sst [smem:[#allocation14_spill]] %s2687_s23  ;;  %s266_s25 = ssub.s32 %s2587_s20, %s2687_s23 }
   0x9   : > { %p279_p0 = scmp.ne.s32.totalorder %s2583_s19, %s2579_s18  ;;  %p267_p1 = scmp.eq.s32.totalorder %s266_s25, 0 }
   0xa   : > { %p280_p2 = scmp.eq.s32.totalorder %s2683_s21, 1  ;;  %p285_p3 = scmp.ne.s32.totalorder %s2579_s18, %s2575_s17 }
   0xb   : > { %p286_p4 = scmp.eq.s32.totalorder %s1978_s22, 1  ;;  %p1979_p7 = scmp.ge.s32.totalorder %s2587_s20, 1 }
   0xc   : > { %s2698_s26 = scalar_select %p267_p1, %s2583_s19, %s269_s24  }
   0xd   : > { %p2700_p5 = por %p280_p2, %p279_p0  ;;  %p2704_p6 = por %p286_p4, %p285_p3 }
   0xe   : > { %3256 = sst [smem:[#allocation15_spill]] %s2698_s26  ;;  %p293_p8 = scmp.lt.s32.totalorder %s2587_s20, 3 }
   0xf   : > { %s3257_s27 = scalar_select %p2700_p5, 1, 0 }
  0x10   : > { %s3258_s28 = scalar_select %p2704_p6, 1, 0 }
  0x11   : > { %p3246_p9 = scmp.eq.s32.totalorder %s2683_s21, 0  ;;  %p2711_p10 = pnand %p1979_p7, %p293_p8 }
  0x12   : > { %3259 = sst [smem:[#allocation16_spill]] %s3258_s28  ;;  %s2589_s30 = smov [#allocation3]  }
  0x13   : > { %s3260_s29 = scalar_select %p2711_p10, 1, 0 }
  0x14   : > { %s326_s12 = sshll.u32 %s2589_s30, 4  ;;  %p2223_p11 = pneg %p2711_p10  ;;  %s327_s12 = int_to_ptr.vmem [resolvable:$true] %s326_s12 }
  0x15   : > { %s2590_s14 = smov [#allocation6]   ;;  %s2461_s24 = scalar_lea.hbm %s3241_s8, 256 }
  0x16   : > { %p2719_p12 = pnand %p3246_p9, %p2223_p11  ;;  %s339_s15 = sshll.u32 %s2590_s14, 4  ;;  %s2723_s15 = int_to_ptr.vmem [resolvable:$true] %s339_s15 }
  0x17   : > { %p2462_p13 = scmp.ne.s32.totalorder %s3241_s8, %s2461_s24  ;;  %p2468_p3 = scmp.lt.u32.totalorder %s2461_s24, %s3241_s8 }
  0x18   : > { %p2463_p0 = pneg %p2719_p12 }
  0x1a   : > { %p2464_p1 = pnand %p2463_p0, %p2462_p13 }
  0x1c   : > { %p2465_p2 = pneg %p2464_p1 }
  0x1e   : > { %p2470_p4 = pnand %p2468_p3, %p2465_p2 }
  0x20   : > { %2473 = shalt.err (!%p2470_p4)
}
  0x21   : > { %s2474_s14 = scalar_lea.vmem %s327_s12, 256  ;;  %p2482_p9 = scmp.lt.s32.totalorder %s327_s12, %s327_s12 }
  0x22   : > { %p2475_p7 = scmp.ne.s32.totalorder %s327_s12, %s2474_s14  ;;  %p2483_p6 = scmp.lt.s32.totalorder %s2474_s14, %s2474_s14 }
  0x24   : > { %p2477_p8 = pnand %p2475_p7, %p2463_p0  ;;  %p2484_p5 = por %p2483_p6, %p2482_p9 }
  0x26   : > { %p2478_p11 = pneg %p2477_p8 }
  0x28   : > { %p2485_p10 = pnand %p2484_p5, %p2478_p11 }
  0x2a   : > { %2488 = shalt.err (!%p2485_p10)
}
  0x2b   : > { %s2591_s16 = smov 128   ;;  %s2592_s22 = smov 8  }
  0x2c   : > { %2226 = dma.hbm_to_vmem [thread:$0]  (!%p2719_p12), %s3241_s8, 256, %s327_s12, [#allocation4], %s2591_s16, %s2591_s16, %s2592_s22  }
  0x2d   : > { %s2489_s30 = scalar_lea.hbm %s3242_s9, 256 }
  0x2e   : > { %p2490_p13 = scmp.ne.s32.totalorder %s3242_s9, %s2489_s30  ;;  %p2496_p9 = scmp.lt.u32.totalorder %s2489_s30, %s3242_s9 }
  0x30   : > { %p2492_p5 = pnand %p2490_p13, %p2463_p0 }
  0x32   : > { %p2493_p6 = pneg %p2492_p5 }
  0x34   : > { %p2498_p10 = pnand %p2496_p9, %p2493_p6 }
  0x36   : > { %2501 = shalt.err (!%p2498_p10)
}
  0x37   : > { %s2502_s12 = scalar_lea.vmem %s2723_s15, 256  ;;  %p2510_p4 = scmp.lt.s32.totalorder %s2723_s15, %s2723_s15 }
  0x38   : > { %p2503_p1 = scmp.ne.s32.totalorder %s2723_s15, %s2502_s12  ;;  %p2511_p7 = scmp.lt.s32.totalorder %s2502_s12, %s2502_s12 }
  0x3a   : > { %p2505_p2 = pnand %p2503_p1, %p2463_p0  ;;  %p2512_p8 = por %p2511_p7, %p2510_p4 }
  0x3c   : > { %p2506_p3 = pneg %p2505_p2 }
  0x3e   : > { %p2513_p11 = pnand %p2512_p8, %p2506_p3 }
  0x40   : > { %2516 = shalt.err (!%p2513_p11)
}
  0x41   : > { %2229 = dma.hbm_to_vmem [thread:$0]  (!%p2719_p12), %s3242_s9, 256, %s2723_s15, [#allocation7], %s2591_s16, %s2591_s16, %s2592_s22  }
  0x42   : > { %p3262_p13 = scmp.ne.s32.totalorder %s3260_s29, 0 }
  0x43   : > { %p3263_p5 = scmp.eq.s32.totalorder (!%p3262_p13), %s2683_s21, 0 }
  0x44   : > { %366 = sbr.rel (%p3262_p13) target bundleno = 2454 (0x996), region = 64 }
  0x4b   : > { %2562 = dma.done.wait (%p3263_p5), [#allocation4], 256   ;;  %p3264_p0 = pmov %p3263_p5 }
  0x4d   : > { %2564 = vsyncadd (%p3264_p0), [#allocation4], 4294967040  ;;  %p3265_p6 = pmov %p3264_p0 }
  0x4e   : > { %p3266_p9 = pmov %p3264_p0 }
  0x4f   : > { %2566 = dma.done.wait (%p3265_p6), [#allocation7], 256  }
  0x50   : > { %2568 = vsyncadd (%p3266_p9), [#allocation7], 4294967040  ;;  %p410_p10 = scmp.lt.s32.totalorder %s2683_s21, 1  ;;  %v2283_v3 = vld [vmem:[%s3234_s1 + $0x4] ss:$16 sps:$4 sm:$0xff]   ;;  %v2593_v34 = vmov 0  }
  0x51   : > { %v2285_v4 = vld [vmem:[%s3234_s1 + $0xc] ss:$16 sps:$4 sm:$0xff]   ;;  %v2287_v5 = vld [vmem:[%s3234_s1] ss:$16 sps:$4 sm:$0xff]   ;;  %635 = vmatprep.subr.bf16.mxu0 %v2283_v3  ;;  %v2288_v7 = vld [vmem:[%s3234_s1 + $0x8] ss:$16 sps:$4 sm:$0xff]   ;;  %667 = vmatprep.mubr.bf16.mxu0 %v2593_v34 }
  0x52   : > { %s411_s28 = scalar_select %p410_p10, %s2683_s21, 1  ;;  %678 = vmatprep.subr.bf16.mxu1 %v2285_v4  ;;  %636 = vmatpush1.bf16.msra.mxu0 %v2287_v5  ;;  %v2289_v8 = vld [vmem:[%s3234_s1 + $0x24] ss:$16 sps:$4 sm:$0xff]   ;;  %v2291_v9 = vld [vmem:[%s3234_s1 + $0x2c] ss:$16 sps:$4 sm:$0xff]   ;;  %v2595_v53 = vmov 0.0  }
  0x53   : > { %679 = vmatpush1.bf16.msra.mxu1 %v2288_v7  ;;  %v2293_v10 = vld [vmem:[%s3234_s1 + $0x20] ss:$16 sps:$4 sm:$0xff]   ;;  %v2294_v11 = vld [vmem:[%s3234_s1 + $0x28] ss:$16 sps:$4 sm:$0xff]   ;;  %637 = vmatprep.subr.bf16.mxu0 %v2289_v8  ;;  %v2295_v12 = vld [vmem:[%s3234_s1 + $0x44] ss:$16 sps:$4 sm:$0xff]  }
  0x54   : > { %s2096_s13 = sshll.u32 %s411_s28, 4  ;;  %680 = vmatprep.subr.bf16.mxu1 %v2291_v9  ;;  %v2297_v13 = vld [vmem:[%s3234_s1 + $0x4c] ss:$16 sps:$4 sm:$0xff]   ;;  %v2299_v14 = vld [vmem:[%s3234_s1 + $0x40] ss:$16 sps:$4 sm:$0xff]   ;;  %710 = vmatprep.mubr.bf16.mxu1 %v2593_v34  ;;  %s2594_s15 = smov 64  }
  0x55   : > { %s2787_s16 = scalar_lea.vmem %s3233_s0, %s2096_s13  ;;  %v2300_v15 = vld [vmem:[%s3234_s1 + $0x48] ss:$16 sps:$4 sm:$0xff]   ;;  %v2301_v16 = vld [vmem:[%s3234_s1 + $0x64] ss:$16 sps:$4 sm:$0xff]   ;;  %v2303_v17 = vld [vmem:[%s3234_s1 + $0x6c] ss:$16 sps:$4 sm:$0xff]  }
  0x56   : > { %v2790_v0 = vld [vmem:[%s2787_s16] sm:$0xff]  ;;  %v2793_v1 = vld [vmem:[%s2787_s16 + $0x8] sm:$0xff]  ;;  %638 = vmatpush1.bf16.msra.mxu0 %v2293_v10  ;;  %v725_v56 = vld [vmem:[#allocation3] sm:$0xff]  ;;  %vm2596_vm0 = vmmov 0   ;;  %s2597_s30 = smov 96   ;;  %vm760_vm1 = vcmask 261120  }
  0x57   : > { %v418_v2 = vmul.f32 %v2790_v0, %v2790_v0  ;;  %v419_v6 = vmul.f32 %v2793_v1, %v2793_v1  ;;  %681 = vmatpush1.bf16.msra.mxu1 %v2294_v11  ;;  %639 = vmatprep.subr.bf16.mxu0 %v2295_v12  ;;  %v2305_v18 = vld [vmem:[%s3234_s1 + $0x60] ss:$16 sps:$4 sm:$0xff]   ;;  %v2306_v19 = vld [vmem:[%s3234_s1 + $0x68] ss:$16 sps:$4 sm:$0xff]   ;;  %v2307_v20 = vld [vmem:[%s3234_s1 + $0x84] ss:$16 sps:$4 sm:$0xff]  }
  0x58   : > { %682 = vmatprep.subr.bf16.mxu1 %v2297_v13  ;;  %v2309_v21 = vld [vmem:[%s3234_s1 + $0x8c] ss:$16 sps:$4 sm:$0xff]   ;;  %v2311_v22 = vld [vmem:[%s3234_s1 + $0x80] ss:$16 sps:$4 sm:$0xff]   ;;  %v2312_v23 = vld [vmem:[%s3234_s1 + $0x88] ss:$16 sps:$4 sm:$0xff]  }
  0x59   : > { %420 = vadd.xlane.f32.xlu0 %v418_v2  ;;  %v2313_v24 = vld [vmem:[%s3234_s1 + $0xa4] ss:$16 sps:$4 sm:$0xff]   ;;  %v2315_v25 = vld [vmem:[%s3234_s1 + $0xac] ss:$16 sps:$4 sm:$0xff]   ;;  %v2317_v26 = vld [vmem:[%s3234_s1 + $0xa0] ss:$16 sps:$4 sm:$0xff]  }
  0x5a   : > { %640 = vmatpush1.bf16.msra.mxu0 %v2299_v14  ;;  %v2318_v27 = vld [vmem:[%s3234_s1 + $0xa8] ss:$16 sps:$4 sm:$0xff]   ;;  %v2319_v28 = vld [vmem:[%s3234_s1 + $0xc4] ss:$16 sps:$4 sm:$0xff]   ;;  %v2321_v29 = vld [vmem:[%s3234_s1 + $0xcc] ss:$16 sps:$4 sm:$0xff]  }
  0x5b   : > { %683 = vmatpush1.bf16.msra.mxu1 %v2300_v15  ;;  %641 = vmatprep.subr.bf16.mxu0 %v2301_v16  ;;  %v2323_v30 = vld [vmem:[%s3234_s1 + $0xc0] ss:$16 sps:$4 sm:$0xff]   ;;  %v2324_v31 = vld [vmem:[%s3234_s1 + $0xc8] ss:$16 sps:$4 sm:$0xff]   ;;  %v2325_v32 = vld [vmem:[%s3234_s1 + $0xe4] ss:$16 sps:$4 sm:$0xff]  }
  0x5c   : > { %684 = vmatprep.subr.bf16.mxu1 %v2303_v17  ;;  %v2327_v33 = vld [vmem:[%s3234_s1 + $0xec] ss:$16 sps:$4 sm:$0xff]   ;;  %v2329_v35 = vld [vmem:[%s3234_s1 + $0xe0] ss:$16 sps:$4 sm:$0xff]   ;;  %v2330_v36 = vld [vmem:[%s3234_s1 + $0xe8] ss:$16 sps:$4 sm:$0xff]  }
  0x5d   : > { %422 = vadd.xlane.f32.xlu0 %v419_v6  ;;  %v735_v37 = vld [vmem:[%s3243_s10] sm:$0xff]  ;;  %v736_v38 = vld [vmem:[%s3243_s10 + $0x8] sm:$0xff]  ;;  %s2598_s14 = smov 32   ;;  %vm808_vm2 = vcmask 130048   ;;  %vm1000_vm3 = vcmask 523520   ;;  %vm1134_vm4 = vcmask 785920  }
  0x5e   : > { %642 = vmatpush1.bf16.msra.mxu0 %v2305_v18  ;;  %739 = vrot.lane.b32.xlu1 %v735_v37, %s2594_s15  ;;  %v1989_v48 = vld [vmem:[%s3238_s5] ss:$0 sm:$0xff]  ;;  %v722_v60 = vld [vmem:[%s3240_s7 + $0x8] sm:$0xff]  ;;  %vm1258_vm5 = vcmask 1048320   ;;  %s407_s12 = sand.u32 1, %s2579_s18   ;;  %s2097_s28 = sshll.u32 %s2683_s21, 8 }
  0x5f   : > { %685 = vmatpush1.bf16.msra.mxu1 %v2306_v19  ;;  %643 = vmatprep.subr.bf16.mxu0 %v2307_v20  ;;  %v721_v55 = vld [vmem:[%s3240_s7] sm:$0xff]  ;;  %v732_v15 = vld [vmem:[#allocation6 + $0x8] sm:$0xff]  ;;  %s3192_s13 = scalar_lea.sflag [#allocation5], %s407_s12  ;;  %p3267_p1 = scmp.ne.s32.totalorder %s3257_s27, 0 }
  0x60   : > { %686 = vmatprep.subr.bf16.mxu1 %v2309_v21  ;;  %v731_v14 = vld [vmem:[#allocation6] sm:$0xff]  ;;  %s2599_s29 = smov [#allocation8]  }
  0x61   : > { %s2521_s22 = sshll.u32 %s2599_s29, 4  ;;  %s2522_s22 = int_to_ptr.vmem [resolvable:$false] %s2521_s22 }
  0x62   : > { %644 = vmatpush1.bf16.msra.mxu0 %v2311_v22  ;;  %741 = vrot.lane.b32.xlu1 %v736_v38, %s2594_s15  ;;  %s2523_s19 = scalar_lea.vmem %s2522_s22, 512 }
  0x63   : > { %687 = vmatpush1.bf16.msra.mxu1 %v2312_v23  ;;  %645 = vmatprep.subr.bf16.mxu0 %v2313_v24 }
  0x64   : > { %688 = vmatprep.subr.bf16.mxu1 %v2315_v25 }
  0x66   : > { %646 = vmatpush1.bf16.msra.mxu0 %v2317_v26 }
  0x67   : > { %689 = vmatpush1.bf16.msra.mxu1 %v2318_v27  ;;  %647 = vmatprep.subr.bf16.mxu0 %v2319_v28 }
  0x68   : > { %690 = vmatprep.subr.bf16.mxu1 %v2321_v29 }
  0x6a   : > { %648 = vmatpush1.bf16.msra.mxu0 %v2323_v30 }
  0x6b   : > { %691 = vmatpush1.bf16.msra.mxu1 %v2324_v31  ;;  %649 = vmatprep.subr.bf16.mxu0 %v2325_v32 }
  0x6c   : > { %692 = vmatprep.subr.bf16.mxu1 %v2327_v33 }
  0x6e   : > { %650 = vmatpush1.bf16.msra.mxu0 %v2329_v35 }
  0x6f   : > { %693 = vmatpush1.bf16.msra.mxu1 %v2330_v36  ;;  %2145 = vmatprep.subr.bf16.mxu0 %v2595_v53 }
  0x70   : > { %2151 = vmatprep.subr.bf16.mxu1 %v2595_v53 }
  0xd0   : > { %v740_v54 = vpop.permute.xlu1 %739 }
  0xd4   : > { %v742_v57 = vpop.permute.xlu1 %741 }
  0xe6   : > { %v421_v39 = vpop.xlane.xlu0 %420 }
  0xe7   : > { %v425_v40 = vmul.f32 0.0078125, %v421_v39 }
  0xe9   : > { %v427_v41 = vadd.f32 1e-06, %v425_v40 }
  0xea   : > { %v423_v42 = vpop.xlane.xlu0 %422 }
  0xeb   : > { %2403 = vrsqrt.f32 %v427_v41  ;;  %v426_v43 = vmul.f32 0.0078125, %v423_v42 }
  0xed   : > { %v428_v44 = vadd.f32 1e-06, %v426_v43 }
  0xef   : > { %2405 = vrsqrt.f32 %v428_v44 }
  0xf5   : > { %v2404_v45 = vpop.eup %2403 }
  0xf6   : > { %v431_v46 = vmul.f32 %v2404_v45, %v2790_v0 }
  0xf8   : > { %v440_v50 = vmul.f32 %v1989_v48, %v431_v46 }
  0xf9   : > { %v2406_v47 = vpop.eup %2405 }
  0xfa   : > { %v432_v49 = vmul.f32 %v2406_v47, %v2793_v1  ;;  %v726_v1 = vld [vmem:[#allocation3 + $0x8] sm:$0xff] }
  0xfc   : > { %v441_v51 = vmul.f32 %v1989_v48, %v432_v49 }
  0xfe   : > { %v442_v52 = vpack.c.bf16 %v441_v51, %v440_v50 }
 0x100   : > { %668 = vmatmul.mubr.bf16.vlgmr.msra.gmra.mrb[0].mxu0 %v442_v52  ;;  %711 = vmatmul.mubr.bf16.vlgmr.msra.gmra.mrb[0].mxu1 %v442_v52 }
 0x101   : > { %2147 = vmatprep.mubr.msk.bf16.mxu0 %vm2596_vm0, %v2595_v53  ;;  %2153 = vmatprep.mubr.msk.bf16.mxu1 %vm2596_vm0, %v2595_v53 }
 0x1d3   : > { %v669_v58 = vpop.f32.mrb[0].mxu0  ;;  %v712_v59 = vpop.f32.mrb[0].mxu1 }
 0x1d4   : > { %v723_v61 = vmul.f32 %v721_v55, %v669_v58  ;;  %v745_v62 = vmul.f32 %v740_v54, %v712_v59  ;;  %v671_v63 = vpop.f32.mrb[1].mxu0  ;;  %v714_v0 = vpop.f32.mrb[1].mxu1  ;;  %v733_v17 = vmul.f32 %v731_v14, %v712_v59 }
 0x1d5   : > { %v727_v2 = vmul.f32 %v725_v56, %v671_v63  ;;  %v673_v3 = vpop.f32.mrb[2].mxu0  ;;  %v716_v4 = vpop.f32.mrb[2].mxu1 }
 0x1d6   : > { %v724_v5 = vmul.f32 %v722_v60, %v673_v3  ;;  %v746_v6 = vmul.f32 %v742_v57, %v716_v4  ;;  %749 = vrot.lane.b32.xlu0 %v745_v62, %s2594_s15  ;;  %v675_v7 = vpop.f32.mrb[3].mxu0  ;;  %v718_v8 = vpop.f32.mrb[3].mxu1  ;;  %v734_v18 = vmul.f32 %v732_v15, %v716_v4 }
 0x1d7   : > { %v729_v9 = vadd.f32 %v727_v2, %v723_v61  ;;  %v728_v10 = vmul.f32 %v726_v1, %v675_v7  ;;  %v2923_v11 = vpack.c.bf16 %v718_v8, %v714_v0 }
 0x1d8   : > { %751 = vrot.lane.b32.xlu1 %v746_v6, %s2594_s15 }
 0x1d9   : > { %v730_v12 = vadd.f32 %v728_v10, %v724_v5  ;;  %2152 = vmatpush3.bf16.msra.mxu1 %v2923_v11 }
 0x1da   : > { %2163 = vmatprep.subr.bf16.mxu1 %v2595_v53 }
 0x1db   : > { %v757_v13 = vpack.c.bf16 %v730_v12, %v729_v9 }
 0x1dd   : > { %879 = vrot.lane.b32.xlu1 %v757_v13, %s2597_s30 }
 0x248   : > { %v750_v16 = vpop.permute.xlu0 %749 }
 0x249   : > { %v755_v20 = vadd.f32 %v750_v16, %v733_v17 }
 0x24a   : > { %v752_v19 = vpop.permute.xlu1 %751 }
 0x24b   : > { %v756_v21 = vadd.f32 %v752_v19, %v734_v18 }
 0x24d   : > { %v758_v22 = vpack.c.bf16 %v756_v21, %v755_v20 }
 0x24f   : > { %1006 = vrot.lane.b32.xlu1 %v758_v22, %s2597_s30  ;;  %v765_v23 = vsel %vm760_vm1, %v758_v22, 0  ;;  %v880_v24 = vpop.permute.xlu1 %879 }
 0x250   : > { %2146 = vmatpush3.bf16.xpose.msra.mxu0 %v765_v23 }
 0x251   : > { %2157 = vmatprep.subr.bf16.mxu0 %v2595_v53 }
 0x253   : > { %1003 = vrot.lane.b32.xlu1 %v757_v13, %s2594_s15 }
 0x257   : > { %1137 = vrot.lane.b32.xlu1 %v757_v13, %s2598_s14  ;;  %2148 = vmatmul.mubr.msk.bf16.vlgmr.msra.gmra.mrb[4].mxu0 %vm760_vm1, %v757_v13 }
 0x258   : > { %2158 = vmatpush3.bf16.xpose.msra.mxu0 %v765_v23  ;;  %2159 = vmatprep.mubr.msk.bf16.mxu0 %vm2596_vm0, %v2595_v53 }
 0x259   : > { %2169 = vmatprep.subr.bf16.mxu0 %v2595_v53 }
 0x25f   : > { %2160 = vmatmul.mubr.msk.bf16.vlgmr.msra.gmra.mrb[8].mxu0 %vm760_vm1, %v880_v24 }
 0x260   : > { %2171 = vmatprep.mubr.msk.bf16.mxu0 %vm2596_vm0, %v2595_v53 }
 0x2c1   : > { %v1007_v25 = vpop.permute.xlu1 %1006 }
 0x2c2   : > { %v1012_v26 = vsel %vm760_vm1, %v1007_v25, 0 }
 0x2c3   : > { %2170 = vmatpush3.bf16.xpose.msra.mxu0 %v1012_v26 }
 0x2c4   : > { %2181 = vmatprep.subr.bf16.mxu0 %v2595_v53 }
 0x2c5   : > { %v1004_v27 = vpop.permute.xlu1 %1003 }
 0x2c9   : > { %v1138_v28 = vpop.permute.xlu1 %1137 }
 0x2ca   : > { %2172 = vmatmul.mubr.msk.bf16.vlgmr.msra.gmra.mrb[12].mxu0 %vm760_vm1, %v1004_v27 }
 0x2cb   : > { %2182 = vmatpush3.bf16.xpose.msra.mxu0 %v1012_v26  ;;  %2183 = vmatprep.mubr.msk.bf16.mxu0 %vm2596_vm0, %v2595_v53 }
 0x2cc   : > { %2193 = vmatprep.subr.bf16.mxu0 %v2595_v53 }
 0x2d2   : > { %2184 = vmatmul.mubr.msk.bf16.vlgmr.msra.gmra.mrb[16].mxu0 %vm760_vm1, %v1138_v28 }
 0x2d3   : > { %2209 = vmatprep.mubr.msk.bf16.mxu0 %vm2596_vm0, %v2595_v53 }
 0x32a   : > { %v801_v29 = vpop.f32.mrb[4].mxu0 }
 0x32b   : > { %v2149_v30 = vpop.f32.mrb[5].mxu0  ;;  %v809_v31 = vsel %vm808_vm2, %v801_v29, -inf }
 0x32c   : > { %810 = vmax.xlane.f32.xlu1 %v809_v31  ;;  %v804_v32 = vpop.f32.mrb[6].mxu0 }
 0x32d   : > { %v2150_v33 = vpop.f32.mrb[7].mxu0  ;;  %v812_v35 = vsel %vm808_vm2, %v804_v32, -inf }
 0x32e   : > { %813 = vmax.xlane.f32.xlu0 %v812_v35 }
 0x332   : > { %v918_v36 = vpop.f32.mrb[8].mxu0 }
 0x333   : > { %v2161_v37 = vpop.f32.mrb[9].mxu0  ;;  %v925_v38 = vsel %vm808_vm2, %v918_v36, -inf }
 0x334   : > { %926 = vmax.xlane.f32.xlu0 %v925_v38  ;;  %v921_v39 = vpop.f32.mrb[10].mxu0 }
 0x335   : > { %v2162_v40 = vpop.f32.mrb[11].mxu0  ;;  %v928_v41 = vsel %vm808_vm2, %v921_v39, -inf }
 0x336   : > { %929 = vmax.xlane.f32.xlu1 %v928_v41 }
 0x39d   : > { %v1048_v42 = vpop.f32.mrb[12].mxu0 }
 0x39e   : > { %v2173_v43 = vpop.f32.mrb[13].mxu0  ;;  %v1055_v44 = vsel %vm808_vm2, %v1048_v42, -inf }
 0x39f   : > { %1056 = vmax.xlane.f32.xlu0 %v1055_v44  ;;  %v1051_v45 = vpop.f32.mrb[14].mxu0 }
 0x3a0   : > { %v2174_v46 = vpop.f32.mrb[15].mxu0  ;;  %v1058_v47 = vsel %vm808_vm2, %v1051_v45, -inf }
 0x3a1   : > { %1059 = vmax.xlane.f32.xlu1 %v1058_v47 }
 0x3a5   : > { %v1176_v48 = vpop.f32.mrb[16].mxu0 }
 0x3a6   : > { %v2185_v49 = vpop.f32.mrb[17].mxu0  ;;  %v1183_v50 = vsel %vm808_vm2, %v1176_v48, -inf }
 0x3a7   : > { %1184 = vmax.xlane.f32.xlu0 %v1183_v50  ;;  %v1179_v51 = vpop.f32.mrb[18].mxu0 }
 0x3a8   : > { %v2186_v52 = vpop.f32.mrb[19].mxu0  ;;  %v1186_v54 = vsel %vm808_vm2, %v1179_v51, -inf }
 0x3a9   : > { %1187 = vmax.xlane.f32.xlu1 %v1186_v54 }
 0x3b9   : > { %v811_v55 = vpop.xlane.xlu1 %810 }
 0x3ba   : > { %v815_v56 = vsub.f32 %v801_v29, %v811_v55 }
 0x3bb   : > { %v814_v57 = vpop.xlane.xlu0 %813 }
 0x3bc   : > { %v817_v58 = vmul.f32 1.442695, %v815_v56  ;;  %v816_v59 = vsub.f32 %v804_v32, %v814_v57 }
 0x3be   : > { %2407 = vpow2.f32 %v817_v58  ;;  %v819_v60 = vmul.f32 1.442695, %v816_v59 }
 0x3c0   : > { %2409 = vpow2.f32 %v819_v60 }
 0x3c1   : > { %v927_v61 = vpop.xlane.xlu0 %926 }
 0x3c2   : > { %v931_v62 = vsub.f32 %v918_v36, %v927_v61 }
 0x3c3   : > { %v930_v63 = vpop.xlane.xlu1 %929 }
 0x3c4   : > { %v933_v0 = vmul.f32 1.442695, %v931_v62  ;;  %v932_v1 = vsub.f32 %v921_v39, %v930_v63  ;;  %v2331_v63 = vld [vmem:[%s3235_s2] sm:$0xff]  }
 0x3c5   : > { %2194 = vmatpush3.bf16.msra.mxu0 %v2331_v63  ;;  %v2369_v63 = vld [vmem:[%s3236_s3 + $0xa0] ss:$16 sps:$4 sm:$0xff]  }
 0x3c6   : > { %2411 = vpow2.f32 %v933_v0  ;;  %v935_v2 = vmul.f32 1.442695, %v932_v1  ;;  %2195 = vmatprep.subr.bf16.mxu0 %v2595_v53 }
 0x3c8   : > { %v2408_v3 = vpop.eup %2407  ;;  %2413 = vpow2.f32 %v935_v2  ;;  %v2332_v2 = vld [vmem:[%s3235_s2 + $0x8] sm:$0xff]  }
 0x3c9   : > { %v821_v4 = vsel %vm808_vm2, %v2408_v3, 0.0  ;;  %2196 = vmatpush3.bf16.msra.mxu0 %v2332_v2  ;;  %v2380_v2 = vld [vmem:[%s3236_s3 + $0xcc] ss:$16 sps:$4 sm:$0xff]  }
 0x3ca   : > { %v2410_v5 = vpop.eup %2409  ;;  %822 = vadd.xlane.f32.xlu0 %v821_v4  ;;  %v2333_v4 = vld [vmem:[%s3235_s2 + $0x10] sm:$0xff]   ;;  %2197 = vmatprep.subr.bf16.mxu0 %v2595_v53 }
 0x3cb   : > { %v824_v6 = vsel %vm808_vm2, %v2410_v5, 0.0 }
 0x3cc   : > { %825 = vadd.xlane.f32.xlu1 %v824_v6 }
 0x3cd   : > { %2198 = vmatpush3.bf16.msra.mxu0 %v2333_v4  ;;  %v2378_v4 = vld [vmem:[%s3236_s3 + $0xc8] ss:$16 sps:$4 sm:$0xff]  }
 0x3ce   : > { %2199 = vmatprep.subr.bf16.mxu0 %v2595_v53 }
 0x3d0   : > { %v2412_v7 = vpop.eup %2411 }
 0x3d1   : > { %v937_v8 = vsel %vm808_vm2, %v2412_v7, 0.0 }
 0x3d2   : > { %v2414_v9 = vpop.eup %2413  ;;  %938 = vadd.xlane.f32.xlu0 %v937_v8 }
 0x3d3   : > { %v940_v10 = vsel %vm808_vm2, %v2414_v9, 0.0 }
 0x3d4   : > { %941 = vadd.xlane.f32.xlu1 %v940_v10  ;;  %v2335_v10 = vld [vmem:[%s3235_s2 + $0x20] sm:$0xff]  }
 0x42c   : > { %v1057_v12 = vpop.xlane.xlu0 %1056 }
 0x42d   : > { %v1061_v13 = vsub.f32 %v1048_v42, %v1057_v12  ;;  %v2336_v12 = vld [vmem:[%s3235_s2 + $0x28] sm:$0xff]  }
 0x42e   : > { %v1060_v14 = vpop.xlane.xlu1 %1059 }
 0x42f   : > { %v1063_v15 = vmul.f32 1.442695, %v1061_v13  ;;  %v1062_v16 = vsub.f32 %v1051_v45, %v1060_v14  ;;  %v2337_v13 = vld [vmem:[%s3235_s2 + $0x30] sm:$0xff]  }
 0x431   : > { %2415 = vpow2.f32 %v1063_v15  ;;  %v1065_v17 = vmul.f32 1.442695, %v1062_v16 }
 0x433   : > { %2417 = vpow2.f32 %v1065_v17  ;;  %v2338_v17 = vld [vmem:[%s3235_s2 + $0x38] sm:$0xff]  }
 0x434   : > { %v1185_v18 = vpop.xlane.xlu0 %1184 }
 0x435   : > { %v1189_v19 = vsub.f32 %v1176_v48, %v1185_v18 }
 0x436   : > { %v1188_v20 = vpop.xlane.xlu1 %1187 }
 0x437   : > { %v1191_v21 = vmul.f32 1.442695, %v1189_v19  ;;  %v1190_v22 = vsub.f32 %v1179_v51, %v1188_v20 }
 0x439   : > { %2419 = vpow2.f32 %v1191_v21  ;;  %v1193_v23 = vmul.f32 1.442695, %v1190_v22 }
 0x43b   : > { %v2416_v24 = vpop.eup %2415  ;;  %2421 = vpow2.f32 %v1193_v23 }
 0x43c   : > { %v1067_v25 = vsel %vm808_vm2, %v2416_v24, 0.0 }
 0x43d   : > { %v2418_v26 = vpop.eup %2417  ;;  %1068 = vadd.xlane.f32.xlu0 %v1067_v25 }
 0x43e   : > { %v1070_v27 = vsel %vm808_vm2, %v2418_v26, 0.0 }
 0x43f   : > { %1071 = vadd.xlane.f32.xlu1 %v1070_v27 }
 0x443   : > { %v2420_v28 = vpop.eup %2419 }
 0x444   : > { %v1195_v29 = vsel %vm808_vm2, %v2420_v28, 0.0 }
 0x445   : > { %v2422_v30 = vpop.eup %2421  ;;  %1196 = vadd.xlane.f32.xlu0 %v1195_v29 }
 0x446   : > { %v1198_v31 = vsel %vm808_vm2, %v2422_v30, 0.0 }
 0x447   : > { %1199 = vadd.xlane.f32.xlu1 %v1198_v31  ;;  %v2339_v31 = vld [vmem:[%s3236_s3] ss:$16 sps:$4 sm:$0xff]  }
 0x457   : > { %v823_v32 = vpop.xlane.xlu0 %822 }
 0x458   : > { %2423 = vrcp.f32 %v823_v32  ;;  %v2341_v32 = vld [vmem:[%s3236_s3 + $0x4] ss:$16 sps:$4 sm:$0xff]  }
 0x459   : > { %v826_v33 = vpop.xlane.xlu1 %825 }
 0x45a   : > { %2425 = vrcp.f32 %v826_v33  ;;  %v2342_v33 = vld [vmem:[%s3236_s3 + $0x8] ss:$16 sps:$4 sm:$0xff]  }
 0x45b   : > { %1079 = vrot.lane.b32.xlu0 %v2923_v11, %s2597_s30 }
 0x45f   : > { %v939_v35 = vpop.xlane.xlu0 %938 }
 0x460   : > { %2427 = vrcp.f32 %v939_v35  ;;  %v2344_v35 = vld [vmem:[%s3236_s3 + $0xc] ss:$16 sps:$4 sm:$0xff]  }
 0x461   : > { %v942_v36 = vpop.xlane.xlu1 %941 }
 0x462   : > { %v2424_v37 = vpop.eup %2423  ;;  %2429 = vrcp.f32 %v942_v36  ;;  %v2350_v36 = vld [vmem:[%s3236_s3 + $0x2c] ss:$16 sps:$4 sm:$0xff]  }
 0x463   : > { %v829_v39 = vmul.f32 %v2424_v37, %v2408_v3  ;;  %v2345_v37 = vld [vmem:[%s3236_s3 + $0x20] ss:$16 sps:$4 sm:$0xff]  }
 0x464   : > { %v2426_v38 = vpop.eup %2425 }
 0x465   : > { %v830_v40 = vmul.f32 %v2426_v38, %v2410_v5  ;;  %v2348_v38 = vld [vmem:[%s3236_s3 + $0x28] ss:$16 sps:$4 sm:$0xff]  }
 0x467   : > { %v831_v41 = vpack.c.bf16 %v830_v40, %v829_v39  ;;  %v2353_v39 = vld [vmem:[%s3236_s3 + $0x44] ss:$16 sps:$4 sm:$0xff]   ;;  %v2356_v40 = vld [vmem:[%s3236_s3 + $0x4c] ss:$16 sps:$4 sm:$0xff]  }
 0x469   : > { %2154 = vmatmul.mubr.msk.bf16.vlgmr.msra.gmra.mrb[4].mxu1 %vm808_vm2, %v831_v41  ;;  %v2351_v41 = vld [vmem:[%s3236_s3 + $0x40] ss:$16 sps:$4 sm:$0xff]  }
 0x46a   : > { %v2428_v42 = vpop.eup %2427  ;;  %2164 = vmatpush3.bf16.msra.mxu1 %v2923_v11  ;;  %2165 = vmatprep.mubr.msk.bf16.mxu1 %vm2596_vm0, %v2595_v53 }
 0x46b   : > { %2175 = vmatprep.subr.bf16.mxu1 %v2595_v53  ;;  %v945_v44 = vmul.f32 %v2428_v42, %v2412_v7  ;;  %v2354_v42 = vld [vmem:[%s3236_s3 + $0x48] ss:$16 sps:$4 sm:$0xff]  }
 0x46c   : > { %v2430_v43 = vpop.eup %2429 }
 0x46d   : > { %v946_v45 = vmul.f32 %v2430_v43, %v2414_v9  ;;  %v2334_v9 = vld [vmem:[%s3235_s2 + $0x18] sm:$0xff]  }
 0x46e   : > { %2200 = vmatpush3.bf16.msra.mxu0 %v2334_v9 }
 0x46f   : > { %v947_v46 = vpack.c.bf16 %v946_v45, %v945_v44  ;;  %2201 = vmatprep.subr.bf16.mxu0 %v2595_v53  ;;  %v2459_v44 = vld [vmem:[%s2787_s16] sm:$0xff] }
 0x471   : > { %2166 = vmatmul.mubr.msk.bf16.vlgmr.msra.gmra.mrb[8].mxu1 %vm808_vm2, %v947_v46 }
 0x472   : > { %2177 = vmatprep.mubr.msk.bf16.mxu1 %vm2596_vm0, %v2595_v53  ;;  %2202 = vmatpush3.bf16.msra.mxu0 %v2335_v10 }
 0x473   : > { %2203 = vmatprep.subr.bf16.mxu0 %v2595_v53 }
 0x476   : > { %2204 = vmatpush3.bf16.msra.mxu0 %v2336_v12 }
 0x477   : > { %2205 = vmatprep.subr.bf16.mxu0 %v2595_v53 }
 0x47a   : > { %2206 = vmatpush3.bf16.msra.mxu0 %v2337_v13 }
 0x47b   : > { %2207 = vmatprep.subr.bf16.mxu0 %v2595_v53 }
 0x47e   : > { %2208 = vmatpush3.bf16.msra.mxu0 %v2338_v17 }
 0x47f   : > { %1630 = vmatprep.subr.bf16.mxu0 %v2344_v35  ;;  %v2398_v35 = vld [vmem:[%s3237_s4 + $0x28] sm:$0xff]  }
 0x4ca   : > { %v1069_v47 = vpop.xlane.xlu0 %1068 }
 0x4cb   : > { %2431 = vrcp.f32 %v1069_v47 }
 0x4cc   : > { %v1072_v48 = vpop.xlane.xlu1 %1071 }
 0x4cd   : > { %2433 = vrcp.f32 %v1072_v48  ;;  %v2460_v48 = vld [vmem:[%s2787_s16 + $0x8] sm:$0xff] }
 0x4d2   : > { %v1197_v49 = vpop.xlane.xlu0 %1196 }
 0x4d3   : > { %2435 = vrcp.f32 %v1197_v49 }
 0x4d4   : > { %v1200_v11 = vpop.xlane.xlu1 %1199 }
 0x4d5   : > { %v2432_v50 = vpop.eup %2431  ;;  %2437 = vrcp.f32 %v1200_v11 }
 0x4d6   : > { %v1080_v51 = vpop.permute.xlu0 %1079  ;;  %v1075_v54 = vmul.f32 %v2432_v50, %v2416_v24 }
 0x4d7   : > { %v2434_v52 = vpop.eup %2433  ;;  %2176 = vmatpush3.bf16.msra.mxu1 %v1080_v51 }
 0x4d8   : > { %v1076_v55 = vmul.f32 %v2434_v52, %v2418_v26  ;;  %2187 = vmatprep.subr.bf16.mxu1 %v2595_v53  ;;  %v2359_v52 = vld [vmem:[%s3236_s3 + $0x64] ss:$16 sps:$4 sm:$0xff]  }
 0x4da   : > { %v1077_v56 = vpack.c.bf16 %v1076_v55, %v1075_v54  ;;  %v2362_v54 = vld [vmem:[%s3236_s3 + $0x6c] ss:$16 sps:$4 sm:$0xff]   ;;  %v2357_v55 = vld [vmem:[%s3236_s3 + $0x60] ss:$16 sps:$4 sm:$0xff]  }
 0x4dc   : > { %2178 = vmatmul.mubr.msk.bf16.vlgmr.msra.gmra.mrb[12].mxu1 %vm808_vm2, %v1077_v56  ;;  %v2360_v56 = vld [vmem:[%s3236_s3 + $0x68] ss:$16 sps:$4 sm:$0xff]  }
 0x4dd   : > { %v2436_v57 = vpop.eup %2435  ;;  %2188 = vmatpush3.bf16.msra.mxu1 %v1080_v51  ;;  %2189 = vmatprep.mubr.msk.bf16.mxu1 %vm2596_vm0, %v2595_v53 }
 0x4de   : > { %v1203_v59 = vmul.f32 %v2436_v57, %v2420_v28  ;;  %1587 = vmatprep.subr.bf16.mxu1 %v2341_v32  ;;  %v2363_v57 = vld [vmem:[%s3236_s3 + $0x80] ss:$16 sps:$4 sm:$0xff]  }
 0x4df   : > { %v2438_v58 = vpop.eup %2437  ;;  %v2396_v32 = vld [vmem:[%s3237_s4 + $0x20] sm:$0xff]  }
 0x4e0   : > { %v1204_v60 = vmul.f32 %v2438_v58, %v2422_v30  ;;  %v2365_v58 = vld [vmem:[%s3236_s3 + $0x84] ss:$16 sps:$4 sm:$0xff]  }
 0x4e2   : > { %v1205_v61 = vpack.c.bf16 %v1204_v60, %v1203_v59  ;;  %v2366_v59 = vld [vmem:[%s3236_s3 + $0x88] ss:$16 sps:$4 sm:$0xff]   ;;  %v2368_v60 = vld [vmem:[%s3236_s3 + $0x8c] ss:$16 sps:$4 sm:$0xff]  }
 0x4e4   : > { %2190 = vmatmul.mubr.msk.bf16.vlgmr.msra.gmra.mrb[16].mxu1 %vm808_vm2, %v1205_v61  ;;  %v2371_v61 = vld [vmem:[%s3236_s3 + $0xa4] ss:$16 sps:$4 sm:$0xff]  }
 0x4e5   : > { %1619 = vmatprep.mubr.bf16.mxu1 %v2593_v34  ;;  %1588 = vmatpush1.bf16.msra.mxu1 %v2339_v31  ;;  %v2395_v31 = vld [vmem:[%s3237_s4 + $0x60] sm:$0xff]  }
 0x53c   : > { %v869_v62 = vpop.f32.mrb[4].mxu1 }
 0x53d   : > { %876 = vst.msk [vmem:[#allocation2] sm:$0xff] %vm760_vm1, %v869_v62  ;;  %v2155_v0 = vpop.f32.mrb[5].mxu1  ;;  %v2374_v62 = vld [vmem:[%s3236_s3 + $0xac] ss:$16 sps:$4 sm:$0xff]  }
 0x53e   : > { %v872_v1 = vpop.f32.mrb[6].mxu1  ;;  %v2372_v0 = vld [vmem:[%s3236_s3 + $0xa8] ss:$16 sps:$4 sm:$0xff]  }
 0x53f   : > { %877 = vst.msk [vmem:[#allocation2 + $0x8] sm:$0xff] %vm760_vm1, %v872_v1  ;;  %v2156_v3 = vpop.f32.mrb[7].mxu1  ;;  %v2377_v1 = vld [vmem:[%s3236_s3 + $0xc4] ss:$16 sps:$4 sm:$0xff]  }
 0x540   : > { %v2375_v3 = vld [vmem:[%s3236_s3 + $0xc0] ss:$16 sps:$4 sm:$0xff]  }
 0x544   : > { %v985_v5 = vpop.f32.mrb[8].mxu1 }
 0x545   : > { %994 = vrot.lane.b32.xlu1 %v985_v5, %s2598_s14  ;;  %v2167_v6 = vpop.f32.mrb[9].mxu1  ;;  %v2383_v5 = vld [vmem:[%s3236_s3 + $0xe4] ss:$16 sps:$4 sm:$0xff]  }
 0x546   : > { %v988_v7 = vpop.f32.mrb[10].mxu1  ;;  %v2386_v6 = vld [vmem:[%s3236_s3 + $0xec] ss:$16 sps:$4 sm:$0xff]  }
 0x547   : > { %v2168_v8 = vpop.f32.mrb[11].mxu1 }
 0x548   : > { %v2384_v8 = vld [vmem:[%s3236_s3 + $0xe8] ss:$16 sps:$4 sm:$0xff]  }
 0x549   : > { %996 = vrot.lane.b32.xlu1 %v988_v7, %s2598_s14  ;;  %v2381_v7 = vld [vmem:[%s3236_s3 + $0xe0] ss:$16 sps:$4 sm:$0xff]   ;;  %s1986_s14 = sshll.u32 %s407_s12, 4 }
 0x54a   : > { %s409_s17 = scalar_lea.vmem [#allocation8], %s1986_s14 }
 0x54b   : > { %s1894_s23 = sshll.u32 %s409_s17, 4  ;;  %s3184_s23 = int_to_ptr.vmem [resolvable:$true] %s1894_s23 }
 0x54c   : > { %s2517_s21 = scalar_lea.vmem %s3184_s23, 256  ;;  %p2524_p4 = scmp.lt.s32.totalorder %s3184_s23, %s2522_s22 }
 0x54d   : > { %p2518_p12 = scmp.ne.s32.totalorder %s3184_s23, %s2517_s21  ;;  %p2525_p7 = scmp.lt.s32.totalorder %s2523_s19, %s2517_s21 }
 0x54f   : > { %p2519_p2 = pnand %p2518_p12, %p3267_p1  ;;  %p2526_p8 = por %p2525_p7, %p2524_p4 }
 0x551   : > { %p2520_p3 = pneg %p2519_p2 }
 0x553   : > { %p2527_p11 = pnand %p2526_p8, %p2520_p3 }
 0x5af   : > { %v1119_v14 = vpop.f32.mrb[12].mxu1 }
 0x5b0   : > { %1128 = vrot.lane.b32.xlu0 %v1119_v14, %s2594_s15  ;;  %v2179_v15 = vpop.f32.mrb[13].mxu1 }
 0x5b1   : > { %v1122_v16 = vpop.f32.mrb[14].mxu1 }
 0x5b2   : > { %1130 = vrot.lane.b32.xlu1 %v1122_v16, %s2594_s15  ;;  %v2180_v18 = vpop.f32.mrb[15].mxu1 }
 0x5b7   : > { %v1243_v19 = vpop.f32.mrb[16].mxu1  ;;  %v995_v20 = vpop.permute.xlu1 %994 }
 0x5b8   : > { %1001 = vst.msk [vmem:[#allocation2] sm:$0xff] %vm1000_vm3, %v995_v20  ;;  %1252 = vrot.lane.b32.xlu0 %v1243_v19, %s2597_s30  ;;  %v2191_v21 = vpop.f32.mrb[17].mxu1  ;;  %v2038_v19 = vld [vmem:[%s3239_s6] ss:$0 sm:$0xff] }
 0x5b9   : > { %v1246_v22 = vpop.f32.mrb[18].mxu1 }
 0x5ba   : > { %1254 = vrot.lane.b32.xlu1 %v1246_v22, %s2597_s30  ;;  %v2192_v23 = vpop.f32.mrb[19].mxu1  ;;  %s3190_s30 = scalar_lea.hbm %s3244_s11, %s2097_s28 }
 0x5bb   : > { %v997_v24 = vpop.permute.xlu1 %996 }
 0x5bc   : > { %1002 = vst.msk [vmem:[#allocation2 + $0x8] sm:$0xff] %vm1000_vm3, %v997_v24  ;;  %v2387_v24 = vld [vmem:[%s3237_s4 + $0x40] sm:$0xff]  }
 0x622   : > { %v1129_v25 = vpop.permute.xlu0 %1128 }
 0x623   : > { %1135 = vst.msk [vmem:[#allocation2] sm:$0xff] %vm1134_vm4, %v1129_v25  ;;  %v2388_v25 = vld [vmem:[%s3237_s4] sm:$0xff]  }
 0x624   : > { %v1131_v26 = vpop.permute.xlu1 %1130 }
 0x625   : > { %1136 = vst.msk [vmem:[#allocation2 + $0x8] sm:$0xff] %vm1134_vm4, %v1131_v26  ;;  %v2389_v26 = vld [vmem:[%s3237_s4 + $0x48] sm:$0xff]  }
 0x62a   : > { %v1253_v53 = vpop.permute.xlu0 %1252 }
 0x62b   : > { %1259 = vst.msk [vmem:[#allocation2] sm:$0xff] %vm1258_vm5, %v1253_v53  ;;  %v2390_v53 = vld [vmem:[%s3237_s4 + $0x8] sm:$0xff]  }
 0x62c   : > { %v1255_v27 = vpop.permute.xlu1 %1254 }
 0x62d   : > { %1260 = vst.msk [vmem:[#allocation2 + $0x8] sm:$0xff] %vm1258_vm5, %v1255_v27  ;;  %v2391_v27 = vld [vmem:[%s3237_s4 + $0x50] sm:$0xff]  }
 0x632   : > { %v1261_v28 = vld [vmem:[#allocation2] sm:$0xff] }
 0x634   : > { %v1262_v29 = vld [vmem:[#allocation2 + $0x8] sm:$0xff] }
 0x635   : > { %v1263_v30 = vpack.c.bf16 %v1262_v29, %v1261_v28  ;;  %v2392_v28 = vld [vmem:[%s3237_s4 + $0x10] sm:$0xff]   ;;  %v2393_v29 = vld [vmem:[%s3237_s4 + $0x58] sm:$0xff]  }
 0x637   : > { %2210 = vmatmul.mubr.bf16.vlgmr.msra.gmra.mrb[20].mxu0 %v1263_v30  ;;  %v2394_v30 = vld [vmem:[%s3237_s4 + $0x18] sm:$0xff]  }
 0x638   : > { %1662 = vmatprep.mubr.bf16.mxu0 %v2593_v34  ;;  %v2347_v34 = vld [vmem:[%s3236_s3 + $0x24] ss:$16 sps:$4 sm:$0xff]   ;;  %1631 = vmatpush1.bf16.msra.mxu0 %v2342_v33  ;;  %v2397_v33 = vld [vmem:[%s3237_s4 + $0x68] sm:$0xff]  }
 0x639   : > { %1589 = vmatprep.subr.bf16.mxu1 %v2347_v34  ;;  %1632 = vmatprep.subr.bf16.mxu0 %v2350_v36  ;;  %v2399_v34 = vld [vmem:[%s3237_s4 + $0x70] sm:$0xff]  }
 0x63a   : > { %1590 = vmatpush1.bf16.msra.mxu1 %v2345_v37  ;;  %v2400_v36 = vld [vmem:[%s3237_s4 + $0x30] sm:$0xff]   ;;  %v2401_v37 = vld [vmem:[%s3237_s4 + $0x78] sm:$0xff]  }
 0x63b   : > { %1591 = vmatprep.subr.bf16.mxu1 %v2353_v39 }
 0x63c   : > { %1633 = vmatpush1.bf16.msra.mxu0 %v2348_v38  ;;  %v2402_v38 = vld [vmem:[%s3237_s4 + $0x38] sm:$0xff]  }
 0x63d   : > { %1634 = vmatprep.subr.bf16.mxu0 %v2356_v40 }
 0x63e   : > { %1592 = vmatpush1.bf16.msra.mxu1 %v2351_v41 }
 0x63f   : > { %1593 = vmatprep.subr.bf16.mxu1 %v2359_v52 }
 0x640   : > { %1635 = vmatpush1.bf16.msra.mxu0 %v2354_v42 }
 0x641   : > { %1636 = vmatprep.subr.bf16.mxu0 %v2362_v54 }
 0x642   : > { %1594 = vmatpush1.bf16.msra.mxu1 %v2357_v55 }
 0x643   : > { %1595 = vmatprep.subr.bf16.mxu1 %v2365_v58 }
 0x644   : > { %1637 = vmatpush1.bf16.msra.mxu0 %v2360_v56 }
 0x645   : > { %1638 = vmatprep.subr.bf16.mxu0 %v2368_v60 }
 0x646   : > { %1596 = vmatpush1.bf16.msra.mxu1 %v2363_v57 }
 0x647   : > { %1597 = vmatprep.subr.bf16.mxu1 %v2371_v61 }
 0x648   : > { %1639 = vmatpush1.bf16.msra.mxu0 %v2366_v59 }
 0x649   : > { %1640 = vmatprep.subr.bf16.mxu0 %v2374_v62 }
 0x64a   : > { %1598 = vmatpush1.bf16.msra.mxu1 %v2369_v63 }
 0x64b   : > { %1599 = vmatprep.subr.bf16.mxu1 %v2377_v1 }
 0x64c   : > { %1641 = vmatpush1.bf16.msra.mxu0 %v2372_v0 }
 0x64d   : > { %1642 = vmatprep.subr.bf16.mxu0 %v2380_v2 }
 0x64e   : > { %1600 = vmatpush1.bf16.msra.mxu1 %v2375_v3 }
 0x64f   : > { %1601 = vmatprep.subr.bf16.mxu1 %v2383_v5 }
 0x650   : > { %1643 = vmatpush1.bf16.msra.mxu0 %v2378_v4 }
 0x651   : > { %1644 = vmatprep.subr.bf16.mxu0 %v2386_v6 }
 0x652   : > { %1602 = vmatpush1.bf16.msra.mxu1 %v2381_v7 }
 0x653   : > { %2123 = vmatprep.subr.bf16.mxu1 %v2387_v24 }
 0x654   : > { %1645 = vmatpush1.bf16.msra.mxu0 %v2384_v8 }
 0x70a   : > { %v1362_v43 = vpop.f32.mrb[20].mxu0 }
 0x70b   : > { %v3059_v45 = vadd.f32 %v2459_v44, %v1362_v43  ;;  %v2211_v46 = vpop.f32.mrb[21].mxu0 }
 0x70c   : > { %v1365_v47 = vpop.f32.mrb[22].mxu0 }
 0x70d   : > { %v3062_v49 = vadd.f32 %v2460_v48, %v1365_v47  ;;  %v2212_v11 = vpop.f32.mrb[23].mxu0  ;;  %v1371_v50 = vmul.f32 %v3059_v45, %v3059_v45 }
 0x70f   : > { %1373 = vadd.xlane.f32.xlu0 %v1371_v50  ;;  %v1372_v51 = vmul.f32 %v3062_v49, %v3062_v49 }
 0x711   : > { %1375 = vadd.xlane.f32.xlu1 %v1372_v51 }
 0x79c   : > { %v1374_v9 = vpop.xlane.xlu0 %1373 }
 0x79d   : > { %v1377_v10 = vmul.f32 0.0078125, %v1374_v9 }
 0x79e   : > { %v1376_v12 = vpop.xlane.xlu1 %1375 }
 0x79f   : > { %v1379_v13 = vadd.f32 1e-06, %v1377_v10  ;;  %v1378_v14 = vmul.f32 0.0078125, %v1376_v12 }
 0x7a1   : > { %2439 = vrsqrt.f32 %v1379_v13  ;;  %v1380_v15 = vadd.f32 1e-06, %v1378_v14 }
 0x7a3   : > { %2441 = vrsqrt.f32 %v1380_v15 }
 0x7ab   : > { %v2440_v16 = vpop.eup %2439 }
 0x7ac   : > { %v1383_v17 = vmul.f32 %v2440_v16, %v3059_v45 }
 0x7ad   : > { %v2442_v18 = vpop.eup %2441 }
 0x7ae   : > { %v1384_v20 = vmul.f32 %v2442_v18, %v3062_v49  ;;  %v1392_v21 = vmul.f32 %v2038_v19, %v1383_v17 }
 0x7b0   : > { %v1393_v22 = vmul.f32 %v2038_v19, %v1384_v20 }
 0x7b2   : > { %v1394_v23 = vpack.c.bf16 %v1393_v22, %v1392_v21 }
 0x7b4   : > { %1620 = vmatmul.mubr.bf16.vlgmr.msra.gmra.mrb[20].mxu1 %v1394_v23  ;;  %1663 = vmatmul.mubr.bf16.vlgmr.msra.gmra.mrb[24].mxu0 %v1394_v23 }
 0x7b5   : > { %2124 = vmatpush3.bf16.msra.mxu1 %v2388_v25 }
 0x7b6   : > { %2125 = vmatprep.subr.bf16.mxu1 %v2389_v26 }
 0x7b9   : > { %2126 = vmatpush3.bf16.msra.mxu1 %v2390_v53 }
 0x7ba   : > { %2127 = vmatprep.subr.bf16.mxu1 %v2391_v27 }
 0x7bd   : > { %2128 = vmatpush3.bf16.msra.mxu1 %v2392_v28 }
 0x7be   : > { %2129 = vmatprep.subr.bf16.mxu1 %v2393_v29 }
 0x7c1   : > { %2130 = vmatpush3.bf16.msra.mxu1 %v2394_v30 }
 0x7c2   : > { %2131 = vmatprep.subr.bf16.mxu1 %v2395_v31 }
 0x7c5   : > { %2132 = vmatpush3.bf16.msra.mxu1 %v2396_v32 }
 0x7c6   : > { %2133 = vmatprep.subr.bf16.mxu1 %v2397_v33 }
 0x7c9   : > { %2134 = vmatpush3.bf16.msra.mxu1 %v2398_v35 }
 0x7ca   : > { %2135 = vmatprep.subr.bf16.mxu1 %v2399_v34 }
 0x7cd   : > { %2136 = vmatpush3.bf16.msra.mxu1 %v2400_v36 }
 0x7ce   : > { %2137 = vmatprep.subr.bf16.mxu1 %v2401_v37 }
 0x7d1   : > { %2138 = vmatpush3.bf16.msra.mxu1 %v2402_v38 }
 0x887   : > { %v1621_v39 = vpop.f32.mrb[20].mxu1  ;;  %v1664_v40 = vpop.f32.mrb[24].mxu0 }
 0x888   : > { %v2071_v41 = vmul.f32 -1.442695, %v1621_v39  ;;  %v1623_v42 = vpop.f32.mrb[21].mxu1  ;;  %v1666_v43 = vpop.f32.mrb[25].mxu0 }
 0x889   : > { %v2072_v44 = vmul.f32 -1.442695, %v1623_v42  ;;  %v1625_v46 = vpop.f32.mrb[22].mxu1  ;;  %v1668_v47 = vpop.f32.mrb[26].mxu0 }
 0x88a   : > { %2443 = vpow2.f32 %v2071_v41  ;;  %v2073_v48 = vmul.f32 -1.442695, %v1625_v46  ;;  %v1627_v11 = vpop.f32.mrb[23].mxu1  ;;  %v1670_v50 = vpop.f32.mrb[27].mxu0 }
 0x88b   : > { %2445 = vpow2.f32 %v2072_v44  ;;  %v2074_v51 = vmul.f32 -1.442695, %v1627_v11 }
 0x88c   : > { %2447 = vpow2.f32 %v2073_v48 }
 0x88d   : > { %2449 = vpow2.f32 %v2074_v51 }
 0x894   : > { %v2444_v52 = vpop.eup %2443 }
 0x895   : > { %v2446_v54 = vpop.eup %2445  ;;  %v1685_v55 = vadd.f32 1.0, %v2444_v52 }
 0x896   : > { %v2448_v56 = vpop.eup %2447  ;;  %v1686_v57 = vadd.f32 1.0, %v2446_v54 }
 0x897   : > { %v2450_v58 = vpop.eup %2449  ;;  %2451 = vrcp.f32 %v1685_v55  ;;  %v1687_v59 = vadd.f32 1.0, %v2448_v56 }
 0x898   : > { %2453 = vrcp.f32 %v1686_v57  ;;  %v1688_v60 = vadd.f32 1.0, %v2450_v58 }
 0x899   : > { %2455 = vrcp.f32 %v1687_v59 }
 0x89a   : > { %2457 = vrcp.f32 %v1688_v60 }
 0x8a1   : > { %v2452_v61 = vpop.eup %2451 }
 0x8a2   : > { %v2454_v62 = vpop.eup %2453  ;;  %v1697_v63 = vmul.f32 %v2452_v61, %v1621_v39 }
 0x8a3   : > { %v2456_v0 = vpop.eup %2455  ;;  %v1698_v1 = vmul.f32 %v2454_v62, %v1623_v42 }
 0x8a4   : > { %v2458_v2 = vpop.eup %2457  ;;  %v1701_v3 = vmul.f32 %v1697_v63, %v1664_v40  ;;  %v1699_v4 = vmul.f32 %v2456_v0, %v1625_v46 }
 0x8a5   : > { %v1702_v5 = vmul.f32 %v1698_v1, %v1666_v43  ;;  %v1700_v6 = vmul.f32 %v2458_v2, %v1627_v11 }
 0x8a6   : > { %v1703_v7 = vmul.f32 %v1699_v4, %v1668_v47 }
 0x8a7   : > { %v1704_v8 = vmul.f32 %v1700_v6, %v1670_v50 }
 0x8a8   : > { %v1705_v9 = vpack.c.bf16 %v1703_v7, %v1701_v3 }
 0x8a9   : > { %v1706_v10 = vpack.c.bf16 %v1704_v8, %v1702_v5 }
 0x8ab   : > { %1867 = vmatprep.mubr.bf16.mxu1 %v1706_v10 }
 0x8ac   : > { %1868 = vmatmul.mubr.bf16.vlgmr.msra.gmra.mrb[24].mxu1 %v1705_v9 }
 0x97f   : > { %v2139_v12 = vpop.f32.mrb[24].mxu1 }
 0x980   : > { %v2140_v13 = vpop.f32.mrb[25].mxu1 }
 0x981   : > { %v2141_v14 = vadd.f32 %v2140_v13, %v2139_v12  ;;  %v2142_v15 = vpop.f32.mrb[26].mxu1 }
 0x982   : > { %v2143_v16 = vpop.f32.mrb[27].mxu1 }
 0x983   : > { %v1876_v17 = vadd.f32 %v2141_v14, %v3059_v45  ;;  %v2144_v18 = vadd.f32 %v2143_v16, %v2142_v15 }
 0x985   : > { %1878 = vst [vmem:[%s409_s17] sm:$0xff] %v1876_v17  ;;  %v1877_v19 = vadd.f32 %v2144_v18, %v3062_v49 }
 0x987   : > { %1879 = vst [vmem:[%s409_s17 + $0x8] sm:$0xff] %v1877_v19 }
 0x988   : > { %2530 = shalt.err (!%p2527_p11)
}
 0x989   : > { %s2531_s26 = scalar_lea.hbm %s3190_s30, 256  ;;  %s2535_s12 = scalar_lea.hbm %s3244_s11, 512 }
 0x98a   : > { %p2532_p13 = scmp.ne.s32.totalorder %s3190_s30, %s2531_s26  ;;  %p2536_p6 = scmp.lt.u32.totalorder %s3190_s30, %s3244_s11 }
 0x98b   : > { %p2537_p9 = scmp.lt.u32.totalorder %s2535_s12, %s2531_s26  ;;  %p2539_p12 = scmp.lt.u32.totalorder %s2531_s26, %s3190_s30 }
 0x98c   : > { %p2533_p5 = pnand %p2532_p13, %p3267_p1 }
 0x98d   : > { %p2538_p10 = por %p2537_p9, %p2536_p6 }
 0x98e   : > { %p2534_p0 = pneg %p2533_p5 }
 0x98f   : > { %p2540_p2 = por %p2539_p12, %p2538_p10 }
 0x991   : > { %p2541_p3 = pnand %p2540_p2, %p2534_p0 }
 0x993   : > { %2544 = shalt.err (!%p2541_p3)
}
 0x994   : > { %s2600_s28 = smov 128   ;;  %s2601_s16 = smov 8  }
 0x995   : > { %2221 = dma.vmem_to_hbm [thread:$0]  (%p3267_p1), %s3184_s23, 256, %s3190_s30, %s3192_s13, %s2600_s28, %s2600_s28, %s2601_s16  }
 0x996 PF: > { %s3268_s15 = sld [smem:[#allocation12_spill]]  ;;  %s3269_s21 = sld [smem:[#allocation16_spill]] }
 0x997   : > { %p2238_p4 = scmp.ge.s32.totalorder %s2587_s20, 2 }
 0x99c   : > { %s1909_s29 = sand.u32 1, %s3268_s15   ;;  %p3270_p7 = scmp.ne.s32.totalorder %s3269_s21, 0 }
 0x99d   : > { %s1910_s22 = scalar_lea.sflag [#allocation5], %s1909_s29 }
 0x99e   : > { %p2231_p8 = pnand %p2238_p4, %p3270_p7 }
 0x9a0   : > { %2570 = dma.done.wait (!%p2231_p8), %s1910_s22, 256  }
 0x9a1   : > { %2572 = vsyncadd (!%p2231_p8), %s1910_s22, 4294967040  ;;  %s3271_s20 = sld [smem:[#allocation14_spill]]  ;;  %s3272_s19 = sld [smem:[#allocation13_spill]] }
 0x9a2   : > { %s3273_s26 = sld [smem:[#allocation15_spill]]  ;;  %s3274_s17 = smov %s2579_s18 }
 0x9a7   : > { %p23_p11 = scmp.ge.s32.totalorder %s3271_s20, 4   ;;  %s3275_s18 = smov %s3272_s19 }
 0x9a8   : > { %s3276_s19 = smov %s3273_s26 }
 0x9a9   :  { %25 = sbr.rel (!%p23_p11) target bundleno = 5 (0x5), region = 108 }
 0x9b0   :  { %1915 = vsyncpa [#allocation4], 1 }
 0x9b1   :  { %1917 = vsyncpa [#allocation4 + $0x1], 1 }
 0x9b2   :  { %1918 = vsyncpa [#allocation7], 1 }
 0x9b3   :  { %1919 = vsyncpa [#allocation5], 1 }
 0x9b4   :  { %1921 = vsyncpa [#allocation5 + $0x1], 1 }

</bundles_post_ra>
